<compile_context>
chip_gen: v6e
topology: v6e:2x2x1
jax: 0.10.0
libtpu: 0.0.40
codegen_flags: <defaults>
</compile_context>

<pallas_src>
import math

import jax
import jax.numpy as jnp
from jax.experimental import pallas as pl
from jax.experimental.pallas import tpu as pltpu

d_model = 384
n_head = 6
d_q = d_model // n_head  # 64
dropout = 0.2            # identity in eval mode


def multihead_kernel(x_ref, wqkv_ref, wp_ref, bp_ref, o_ref):
    b_blk, T, D = x_ref.shape
    R = b_blk * T

    # ---- Fused QKV projection: one MXU matmul (M=R, K=384, N=1152). ----
    # x arrives bf16 from the wrapper; Wq is pre-scaled by 1/sqrt(d_q).
    x = x_ref[...].reshape(R, D)                                      # (R, D) bf16
    qkv = jnp.dot(x, wqkv_ref[...],
                  preferred_element_type=jnp.float32)                 # (R, 3D) f32
    qkv = qkv.astype(jnp.bfloat16)                                    # cast ONCE

    # 128-aligned lane slices of the fused result.
    q_all = qkv[:, 0:D].reshape(b_blk, T, D)                          # pre-scaled q
    k_all = qkv[:, D:2 * D].reshape(b_blk, T, D)
    v_all = qkv[:, 2 * D:3 * D].reshape(b_blk, T, D)

    # ---- Causal mask (finite fill value; safe under later bf16 casts). ----
    row = jax.lax.broadcasted_iota(jnp.int32, (T, T), 0)
    col = jax.lax.broadcasted_iota(jnp.int32, (T, T), 1)
    causal = (row >= col)[None]                                       # (1, T, T)
    neg_fill = jnp.float32(-1e30)

    # ---- Attention: batched over the batch dim, fixed small loop over heads. ----
    head_outs = []
    for h in range(n_head):
        lo = h * d_q
        q = q_all[:, :, lo:lo + d_q]                                  # (b, T, 64)
        k = k_all[:, :, lo:lo + d_q]
        v = v_all[:, :, lo:lo + d_q]
        # scores = q @ k^T (q already carries the 1/sqrt(d_q) scale), f32 accum
        s = jnp.einsum("bqd,bkd->bqk", q, k,
                       preferred_element_type=jnp.float32)            # (b, T, T)
        s = jnp.where(causal, s, neg_fill)
        s = s - jnp.max(s, axis=-1, keepdims=True)
        p = jnp.exp(s)
        p = p * pl.reciprocal(jnp.sum(p, axis=-1, keepdims=True), approx=True)
        o_h = jnp.einsum("bqk,bkd->bqd", p.astype(jnp.bfloat16), v,
                         preferred_element_type=jnp.float32)          # (b, T, 64)
        head_outs.append(o_h.astype(jnp.bfloat16))                    # bf16 pre-concat

    concat = jnp.concatenate(head_outs, axis=-1).reshape(R, D)        # (R, D) bf16

    # ---- Single output projection (K = D = 384) + bias. ----
    out = jnp.dot(concat, wp_ref[...],
                  preferred_element_type=jnp.float32)                 # (R, D) f32
    out = out + bp_ref[...]                                           # (1, D) bcast
    o_ref[...] = out.reshape(b_blk, T, D).astype(o_ref.dtype)


def prepare_params(wq, wk, wv, wp, bp):
    """One-time parameter preprocessing (hoisted out of every forward call).

    Fuses Wq/Wk/Wv into one (D, 3D) bf16 operand with the 1/sqrt(d_q) softmax
    scale folded into Wq (power of two -> exact in bf16)."""
    scale = 1.0 / math.sqrt(d_q)
    wqkv = jnp.concatenate(
        [jnp.asarray(wq, jnp.float32) * scale,
         jnp.asarray(wk, jnp.float32),
         jnp.asarray(wv, jnp.float32)], axis=1).astype(jnp.bfloat16)   # (D, 3D)
    wp_bf = jnp.asarray(wp).astype(jnp.bfloat16)                       # (D, D)
    bp2 = jnp.asarray(bp, jnp.float32).reshape(1, d_model)             # (1, D)
    return wqkv, wp_bf, bp2


def _choose_batch_block(B, T, rows_target=256):
    """Batch elements per grid step.

    Packs rows to fill the MXU M dim, but always leaves >= 2 grid steps when
    B > 1 so (a) the 'parallel' axis can shard across v7x's 2 TensorCores and
    (b) the BlockSpec pipeline has steps to hide x-in / out-writeback DMA."""
    b = 1
    for cand in range(1, B + 1):
        if B % cand == 0 and cand * T <= rows_target:
            b = cand
    if b == B and B > 1:
        for cand in range(B // 2, 0, -1):
            if B % cand == 0:
                b = cand
                break
    return b


def _vmem_limit_bytes(b_blk, T):
    """Rough VMEM need for one grid step, with headroom, capped for v7x."""
    R = b_blk * T
    D = d_model
    est = 0
    est += 2 * (b_blk * T * D * 2)          # x block (bf16), double-buffered
    est += 2 * (b_blk * T * D * 4)          # out block (f32), double-buffered
    est += 2 * (D * 3 * D * 2)              # fused QKV weight (bf16)
    est += 2 * (D * D * 2)                  # proj weight (bf16)
    est += 2 * (1 * D * 4)                  # bias
    est += R * 3 * D * (4 + 2)              # qkv f32 result + bf16 copy
    est += 2 * b_blk * T * T * 4            # live per-head scores / probs
    est += R * D * (2 + 4)                  # concat (bf16) + proj accumulator (f32)
    est = int(est * 1.5) + (4 << 20)        # headroom for compiler scratch
    # v7x has 64 MiB physical VMEM per TensorCore -> never request more than 48 MiB.
    return max(32 << 20, min(est, 48 << 20))


def multihead_forward(x, params, *, rows_target=256):
    wqkv, wp_bf, bp2 = params
    B, T, D = x.shape
    assert D == d_model
    b_blk = _choose_batch_block(B, T, rows_target)
    grid = (B // b_blk,)

    # Cast x once in the wrapper: numerically identical to casting inside the
    # kernel, but halves the x HBM->VMEM DMA bytes.  Output stays in x.dtype.
    x_bf = x.astype(jnp.bfloat16)

    return pl.pallas_call(
        multihead_kernel,
        out_shape=jax.ShapeDtypeStruct((B, T, D), x.dtype),
        grid_spec=pltpu.PrefetchScalarGridSpec(
            num_scalar_prefetch=0,
            grid=grid,
            in_specs=[
                pl.BlockSpec((b_blk, T, D), lambda i: (i, 0, 0)),   # x (bf16)
                pl.BlockSpec((D, 3 * D), lambda i: (0, 0)),         # W_qkv (bf16, scaled)
                pl.BlockSpec((D, D), lambda i: (0, 0)),             # W_proj (bf16)
                pl.BlockSpec((1, D), lambda i: (0, 0)),             # b_proj (f32)
            ],
            out_specs=pl.BlockSpec((b_blk, T, D), lambda i: (i, 0, 0)),
        ),
        compiler_params=pltpu.CompilerParams(
            dimension_semantics=("parallel",),
            vmem_limit_bytes=_vmem_limit_bytes(b_blk, T),
        ),
    )(x_bf, wqkv, wp_bf, bp2)


def multihead_reference(x, wq, wk, wv, wp, bp):
    """Pure-JAX f32 reference of the PyTorch MultiHead forward (eval mode)."""
    B, T, D = x.shape
    xf = x.astype(jnp.float32)
    q = xf @ wq
    k = xf @ wk
    v = xf @ wv
    q = q.reshape(B, T, n_head, d_q).transpose(0, 2, 1, 3)
    k = k.reshape(B, T, n_head, d_q).transpose(0, 2, 1, 3)
    v = v.reshape(B, T, n_head, d_q).transpose(0, 2, 1, 3)
    s = jnp.einsum("bhqd,bhkd->bhqk", q, k) / math.sqrt(d_q)
    mask = jnp.tril(jnp.ones((T, T), bool))
    s = jnp.where(mask[None, None], s, -jnp.inf)
    p = jax.nn.softmax(s, axis=-1)
    o = jnp.einsum("bhqk,bhkd->bhqd", p, v)
    o = o.transpose(0, 2, 1, 3).reshape(B, T, D)
    return (o @ wp + bp).astype(x.dtype)


if __name__ == "__main__":
    key = jax.random.PRNGKey(0)
    kx, kq, kk, kv, kp, kb = jax.random.split(key, 6)

    B, T = 2, 8
    x = jax.random.normal(kx, (B, T, d_model), jnp.float32)

    scale_w = 1.0 / math.sqrt(d_model)
    wq = jax.random.normal(kq, (d_model, d_model), jnp.float32) * scale_w
    wk = jax.random.normal(kk, (d_model, d_model), jnp.float32) * scale_w
    wv = jax.random.normal(kv, (d_model, d_model), jnp.float32) * scale_w
    wp = jax.random.normal(kp, (d_model, d_model), jnp.float32) * scale_w
    bp = jax.random.normal(kb, (d_model,), jnp.float32) * 0.01

    params = prepare_params(wq, wk, wv, wp, bp)
    out = jax.block_until_ready(multihead_forward(x, params))
    ref = multihead_reference(x, wq, wk, wv, wp, bp)

    assert out.shape == (B, T, d_model)
    max_err = jnp.max(jnp.abs(out - ref))
    # bf16 MXU operands with f32 accumulation (and approx softmax reciprocal) ->
    # compare to the f32 reference at a bfloat16-consistent tolerance.
    assert jnp.allclose(out, ref, atol=5e-2, rtol=5e-2), (
        f"mismatch vs reference: max_abs_err={max_err}")
    print("KERNEL_OK")
</pallas_src>

<mosaic_0001>
module attributes {stable_mosaic.version = 11 : i64} {
  func.func @multihead_kernel(%arg0: i32, %arg1: memref<1x8x384xbf16, #tpu.memory_space<vmem>>, %arg2: memref<384x1152xbf16, #tpu.memory_space<vmem>>, %arg3: memref<384x384xbf16, #tpu.memory_space<vmem>>, %arg4: memref<1x384xf32, #tpu.memory_space<vmem>>, %arg5: memref<1x8x384xf32, #tpu.memory_space<vmem>>) attributes {dimension_semantics = [#tpu.dimension_semantics<parallel>], iteration_bounds = array<i64: 2>, scalar_prefetch = 0 : i64, scratch_operands = 0 : i64, tpu.core_type = #tpu.core_type<tc>, window_params = [{transform_indices = @transform_0, window_bounds = array<i64: 1, 8, 384>}, {pipeline_mode = #tpu.pipeline_mode<synchronous>, transform_indices = @transform_1, window_bounds = array<i64: 384, 1152>}, {pipeline_mode = #tpu.pipeline_mode<synchronous>, transform_indices = @transform_2, window_bounds = array<i64: 384, 384>}, {pipeline_mode = #tpu.pipeline_mode<synchronous>, transform_indices = @transform_3, window_bounds = array<i64: 1, 384>}, {transform_indices = @transform_4, window_bounds = array<i64: 1, 8, 384>}]} {
    %c0 = arith.constant 0 : index
    %c0_0 = arith.constant 0 : index
    %c0_1 = arith.constant 0 : index
    %0 = vector.load %arg1[%c0, %c0_0, %c0_1] : memref<1x8x384xbf16, #tpu.memory_space<vmem>>, vector<1x8x384xbf16>
    %1 = vector.shape_cast %0 : vector<1x8x384xbf16> to vector<8x384xbf16>
    %c0_2 = arith.constant 0 : index
    %c0_3 = arith.constant 0 : index
    %2 = vector.load %arg2[%c0_2, %c0_3] : memref<384x1152xbf16, #tpu.memory_space<vmem>>, vector<384x1152xbf16>
    %cst = arith.constant dense<0.000000e+00> : vector<8x1152xf32>
    %3 = tpu.matmul %1, %2, %cst {dimension_numbers = #tpu.dot_dimension_numbers<[1], [0], [0], [1], [0, 0, 1, 1], [], []>} : vector<8x384xbf16>, vector<384x1152xbf16>, vector<8x1152xf32> -> vector<8x1152xf32>
    %4 = arith.truncf %3 : vector<8x1152xf32> to vector<8x1152xbf16>
    %5 = vector.extract_strided_slice %4 {offsets = [0, 0], sizes = [8, 384], strides = [1, 1]} : vector<8x1152xbf16> to vector<8x384xbf16>
    %6 = vector.shape_cast %5 : vector<8x384xbf16> to vector<1x8x384xbf16>
    %7 = vector.extract_strided_slice %4 {offsets = [0, 384], sizes = [8, 384], strides = [1, 1]} : vector<8x1152xbf16> to vector<8x384xbf16>
    %8 = vector.shape_cast %7 : vector<8x384xbf16> to vector<1x8x384xbf16>
    %9 = vector.extract_strided_slice %4 {offsets = [0, 768], sizes = [8, 384], strides = [1, 1]} : vector<8x1152xbf16> to vector<8x384xbf16>
    %10 = vector.shape_cast %9 : vector<8x384xbf16> to vector<1x8x384xbf16>
    %11 = tpu.iota {dimensions = array<i32: 0>} : vector<8x8xi32>
    %12 = tpu.iota {dimensions = array<i32: 1>} : vector<8x8xi32>
    %13 = arith.cmpi sge, %11, %12 : vector<8x8xi32>
    %14 = vector.shape_cast %13 : vector<8x8xi1> to vector<1x8x8xi1>
    %15 = vector.extract_strided_slice %6 {offsets = [0, 0, 0], sizes = [1, 8, 64], strides = [1, 1, 1]} : vector<1x8x384xbf16> to vector<1x8x64xbf16>
    %16 = vector.extract_strided_slice %8 {offsets = [0, 0, 0], sizes = [1, 8, 64], strides = [1, 1, 1]} : vector<1x8x384xbf16> to vector<1x8x64xbf16>
    %17 = vector.extract_strided_slice %10 {offsets = [0, 0, 0], sizes = [1, 8, 64], strides = [1, 1, 1]} : vector<1x8x384xbf16> to vector<1x8x64xbf16>
    "tpu.trace_start"() <{level = 10 : i32, message = "bqd,bkd->bqk"}> : () -> ()
    %cst_4 = arith.constant dense<0.000000e+00> : vector<1x8x8xf32>
    %18 = tpu.matmul %15, %16, %cst_4 {dimension_numbers = #tpu.dot_dimension_numbers<[2], [2], [1], [1], [0, 0, 0, 1, 1, 1], [0], [0]>} : vector<1x8x64xbf16>, vector<1x8x64xbf16>, vector<1x8x8xf32> -> vector<1x8x8xf32>
    %cst_5 = arith.constant -1.000000e+30 : f32
    "tpu.trace_stop"() : () -> ()
    %19 = vector.broadcast %cst_5 : f32 to vector<1x8x8xf32>
    %20 = arith.select %14, %18, %19 : vector<1x8x8xi1>, vector<1x8x8xf32>
    %cst_6 = arith.constant dense<0xFF800000> : vector<1x8xf32>
    %21 = vector.multi_reduction <maximumf>, %20, %cst_6 [2] : vector<1x8x8xf32> to vector<1x8xf32>
    %22 = vector.shape_cast %21 : vector<1x8xf32> to vector<1x8x1xf32>
    %23 = vector.broadcast %22 : vector<1x8x1xf32> to vector<1x8x8xf32>
    %24 = arith.subf %20, %23 : vector<1x8x8xf32>
    %25 = math.exp %24 : vector<1x8x8xf32>
    %cst_7 = arith.constant dense<0.000000e+00> : vector<1x8xf32>
    %26 = vector.multi_reduction <add>, %25, %cst_7 [2] : vector<1x8x8xf32> to vector<1x8xf32>
    %27 = vector.shape_cast %26 : vector<1x8xf32> to vector<1x8x1xf32>
    %28 = tpu.reciprocal %27 {approx = true} : vector<1x8x1xf32> -> vector<1x8x1xf32>
    %29 = vector.broadcast %28 : vector<1x8x1xf32> to vector<1x8x8xf32>
    %30 = arith.mulf %25, %29 : vector<1x8x8xf32>
    %31 = arith.truncf %30 : vector<1x8x8xf32> to vector<1x8x8xbf16>
    "tpu.trace_start"() <{level = 10 : i32, message = "bqk,bkd->bqd"}> : () -> ()
    %cst_8 = arith.constant dense<0.000000e+00> : vector<1x8x64xf32>
    %32 = tpu.matmul %31, %17, %cst_8 {dimension_numbers = #tpu.dot_dimension_numbers<[2], [1], [1], [2], [0, 0, 0, 1, 1, 2], [0], [0]>} : vector<1x8x8xbf16>, vector<1x8x64xbf16>, vector<1x8x64xf32> -> vector<1x8x64xf32>
    "tpu.trace_stop"() : () -> ()
    %33 = arith.truncf %32 : vector<1x8x64xf32> to vector<1x8x64xbf16>
    %34 = vector.extract_strided_slice %6 {offsets = [0, 0, 64], sizes = [1, 8, 64], strides = [1, 1, 1]} : vector<1x8x384xbf16> to vector<1x8x64xbf16>
    %35 = vector.extract_strided_slice %8 {offsets = [0, 0, 64], sizes = [1, 8, 64], strides = [1, 1, 1]} : vector<1x8x384xbf16> to vector<1x8x64xbf16>
    %36 = vector.extract_strided_slice %10 {offsets = [0, 0, 64], sizes = [1, 8, 64], strides = [1, 1, 1]} : vector<1x8x384xbf16> to vector<1x8x64xbf16>
    "tpu.trace_start"() <{level = 10 : i32, message = "bqd,bkd->bqk"}> : () -> ()
    %cst_9 = arith.constant dense<0.000000e+00> : vector<1x8x8xf32>
    %37 = tpu.matmul %34, %35, %cst_9 {dimension_numbers = #tpu.dot_dimension_numbers<[2], [2], [1], [1], [0, 0, 0, 1, 1, 1], [0], [0]>} : vector<1x8x64xbf16>, vector<1x8x64xbf16>, vector<1x8x8xf32> -> vector<1x8x8xf32>
    %cst_10 = arith.constant -1.000000e+30 : f32
    "tpu.trace_stop"() : () -> ()
    %38 = vector.broadcast %cst_10 : f32 to vector<1x8x8xf32>
    %39 = arith.select %14, %37, %38 : vector<1x8x8xi1>, vector<1x8x8xf32>
    %cst_11 = arith.constant dense<0xFF800000> : vector<1x8xf32>
    %40 = vector.multi_reduction <maximumf>, %39, %cst_11 [2] : vector<1x8x8xf32> to vector<1x8xf32>
    %41 = vector.shape_cast %40 : vector<1x8xf32> to vector<1x8x1xf32>
    %42 = vector.broadcast %41 : vector<1x8x1xf32> to vector<1x8x8xf32>
    %43 = arith.subf %39, %42 : vector<1x8x8xf32>
    %44 = math.exp %43 : vector<1x8x8xf32>
    %cst_12 = arith.constant dense<0.000000e+00> : vector<1x8xf32>
    %45 = vector.multi_reduction <add>, %44, %cst_12 [2] : vector<1x8x8xf32> to vector<1x8xf32>
    %46 = vector.shape_cast %45 : vector<1x8xf32> to vector<1x8x1xf32>
    %47 = tpu.reciprocal %46 {approx = true} : vector<1x8x1xf32> -> vector<1x8x1xf32>
    %48 = vector.broadcast %47 : vector<1x8x1xf32> to vector<1x8x8xf32>
    %49 = arith.mulf %44, %48 : vector<1x8x8xf32>
    %50 = arith.truncf %49 : vector<1x8x8xf32> to vector<1x8x8xbf16>
    "tpu.trace_start"() <{level = 10 : i32, message = "bqk,bkd->bqd"}> : () -> ()
    %cst_13 = arith.constant dense<0.000000e+00> : vector<1x8x64xf32>
    %51 = tpu.matmul %50, %36, %cst_13 {dimension_numbers = #tpu.dot_dimension_numbers<[2], [1], [1], [2], [0, 0, 0, 1, 1, 2], [0], [0]>} : vector<1x8x8xbf16>, vector<1x8x64xbf16>, vector<1x8x64xf32> -> vector<1x8x64xf32>
    "tpu.trace_stop"() : () -> ()
    %52 = arith.truncf %51 : vector<1x8x64xf32> to vector<1x8x64xbf16>
    %53 = vector.extract_strided_slice %6 {offsets = [0, 0, 128], sizes = [1, 8, 64], strides = [1, 1, 1]} : vector<1x8x384xbf16> to vector<1x8x64xbf16>
    %54 = vector.extract_strided_slice %8 {offsets = [0, 0, 128], sizes = [1, 8, 64], strides = [1, 1, 1]} : vector<1x8x384xbf16> to vector<1x8x64xbf16>
    %55 = vector.extract_strided_slice %10 {offsets = [0, 0, 128], sizes = [1, 8, 64], strides = [1, 1, 1]} : vector<1x8x384xbf16> to vector<1x8x64xbf16>
    "tpu.trace_start"() <{level = 10 : i32, message = "bqd,bkd->bqk"}> : () -> ()
    %cst_14 = arith.constant dense<0.000000e+00> : vector<1x8x8xf32>
    %56 = tpu.matmul %53, %54, %cst_14 {dimension_numbers = #tpu.dot_dimension_numbers<[2], [2], [1], [1], [0, 0, 0, 1, 1, 1], [0], [0]>} : vector<1x8x64xbf16>, vector<1x8x64xbf16>, vector<1x8x8xf32> -> vector<1x8x8xf32>
    %cst_15 = arith.constant -1.000000e+30 : f32
    "tpu.trace_stop"() : () -> ()
    %57 = vector.broadcast %cst_15 : f32 to vector<1x8x8xf32>
    %58 = arith.select %14, %56, %57 : vector<1x8x8xi1>, vector<1x8x8xf32>
    %cst_16 = arith.constant dense<0xFF800000> : vector<1x8xf32>
    %59 = vector.multi_reduction <maximumf>, %58, %cst_16 [2] : vector<1x8x8xf32> to vector<1x8xf32>
    %60 = vector.shape_cast %59 : vector<1x8xf32> to vector<1x8x1xf32>
    %61 = vector.broadcast %60 : vector<1x8x1xf32> to vector<1x8x8xf32>
    %62 = arith.subf %58, %61 : vector<1x8x8xf32>
    %63 = math.exp %62 : vector<1x8x8xf32>
    %cst_17 = arith.constant dense<0.000000e+00> : vector<1x8xf32>
    %64 = vector.multi_reduction <add>, %63, %cst_17 [2] : vector<1x8x8xf32> to vector<1x8xf32>
    %65 = vector.shape_cast %64 : vector<1x8xf32> to vector<1x8x1xf32>
    %66 = tpu.reciprocal %65 {approx = true} : vector<1x8x1xf32> -> vector<1x8x1xf32>
    %67 = vector.broadcast %66 : vector<1x8x1xf32> to vector<1x8x8xf32>
    %68 = arith.mulf %63, %67 : vector<1x8x8xf32>
    %69 = arith.truncf %68 : vector<1x8x8xf32> to vector<1x8x8xbf16>
    "tpu.trace_start"() <{level = 10 : i32, message = "bqk,bkd->bqd"}> : () -> ()
    %cst_18 = arith.constant dense<0.000000e+00> : vector<1x8x64xf32>
    %70 = tpu.matmul %69, %55, %cst_18 {dimension_numbers = #tpu.dot_dimension_numbers<[2], [1], [1], [2], [0, 0, 0, 1, 1, 2], [0], [0]>} : vector<1x8x8xbf16>, vector<1x8x64xbf16>, vector<1x8x64xf32> -> vector<1x8x64xf32>
    "tpu.trace_stop"() : () -> ()
    %71 = arith.truncf %70 : vector<1x8x64xf32> to vector<1x8x64xbf16>
    %72 = vector.extract_strided_slice %6 {offsets = [0, 0, 192], sizes = [1, 8, 64], strides = [1, 1, 1]} : vector<1x8x384xbf16> to vector<1x8x64xbf16>
    %73 = vector.extract_strided_slice %8 {offsets = [0, 0, 192], sizes = [1, 8, 64], strides = [1, 1, 1]} : vector<1x8x384xbf16> to vector<1x8x64xbf16>
    %74 = vector.extract_strided_slice %10 {offsets = [0, 0, 192], sizes = [1, 8, 64], strides = [1, 1, 1]} : vector<1x8x384xbf16> to vector<1x8x64xbf16>
    "tpu.trace_start"() <{level = 10 : i32, message = "bqd,bkd->bqk"}> : () -> ()
    %cst_19 = arith.constant dense<0.000000e+00> : vector<1x8x8xf32>
    %75 = tpu.matmul %72, %73, %cst_19 {dimension_numbers = #tpu.dot_dimension_numbers<[2], [2], [1], [1], [0, 0, 0, 1, 1, 1], [0], [0]>} : vector<1x8x64xbf16>, vector<1x8x64xbf16>, vector<1x8x8xf32> -> vector<1x8x8xf32>
    %cst_20 = arith.constant -1.000000e+30 : f32
    "tpu.trace_stop"() : () -> ()
    %76 = vector.broadcast %cst_20 : f32 to vector<1x8x8xf32>
    %77 = arith.select %14, %75, %76 : vector<1x8x8xi1>, vector<1x8x8xf32>
    %cst_21 = arith.constant dense<0xFF800000> : vector<1x8xf32>
    %78 = vector.multi_reduction <maximumf>, %77, %cst_21 [2] : vector<1x8x8xf32> to vector<1x8xf32>
    %79 = vector.shape_cast %78 : vector<1x8xf32> to vector<1x8x1xf32>
    %80 = vector.broadcast %79 : vector<1x8x1xf32> to vector<1x8x8xf32>
    %81 = arith.subf %77, %80 : vector<1x8x8xf32>
    %82 = math.exp %81 : vector<1x8x8xf32>
    %cst_22 = arith.constant dense<0.000000e+00> : vector<1x8xf32>
    %83 = vector.multi_reduction <add>, %82, %cst_22 [2] : vector<1x8x8xf32> to vector<1x8xf32>
    %84 = vector.shape_cast %83 : vector<1x8xf32> to vector<1x8x1xf32>
    %85 = tpu.reciprocal %84 {approx = true} : vector<1x8x1xf32> -> vector<1x8x1xf32>
    %86 = vector.broadcast %85 : vector<1x8x1xf32> to vector<1x8x8xf32>
    %87 = arith.mulf %82, %86 : vector<1x8x8xf32>
    %88 = arith.truncf %87 : vector<1x8x8xf32> to vector<1x8x8xbf16>
    "tpu.trace_start"() <{level = 10 : i32, message = "bqk,bkd->bqd"}> : () -> ()
    %cst_23 = arith.constant dense<0.000000e+00> : vector<1x8x64xf32>
    %89 = tpu.matmul %88, %74, %cst_23 {dimension_numbers = #tpu.dot_dimension_numbers<[2], [1], [1], [2], [0, 0, 0, 1, 1, 2], [0], [0]>} : vector<1x8x8xbf16>, vector<1x8x64xbf16>, vector<1x8x64xf32> -> vector<1x8x64xf32>
    "tpu.trace_stop"() : () -> ()
    %90 = arith.truncf %89 : vector<1x8x64xf32> to vector<1x8x64xbf16>
    %91 = vector.extract_strided_slice %6 {offsets = [0, 0, 256], sizes = [1, 8, 64], strides = [1, 1, 1]} : vector<1x8x384xbf16> to vector<1x8x64xbf16>
    %92 = vector.extract_strided_slice %8 {offsets = [0, 0, 256], sizes = [1, 8, 64], strides = [1, 1, 1]} : vector<1x8x384xbf16> to vector<1x8x64xbf16>
    %93 = vector.extract_strided_slice %10 {offsets = [0, 0, 256], sizes = [1, 8, 64], strides = [1, 1, 1]} : vector<1x8x384xbf16> to vector<1x8x64xbf16>
    "tpu.trace_start"() <{level = 10 : i32, message = "bqd,bkd->bqk"}> : () -> ()
    %cst_24 = arith.constant dense<0.000000e+00> : vector<1x8x8xf32>
    %94 = tpu.matmul %91, %92, %cst_24 {dimension_numbers = #tpu.dot_dimension_numbers<[2], [2], [1], [1], [0, 0, 0, 1, 1, 1], [0], [0]>} : vector<1x8x64xbf16>, vector<1x8x64xbf16>, vector<1x8x8xf32> -> vector<1x8x8xf32>
    %cst_25 = arith.constant -1.000000e+30 : f32
    "tpu.trace_stop"() : () -> ()
    %95 = vector.broadcast %cst_25 : f32 to vector<1x8x8xf32>
    %96 = arith.select %14, %94, %95 : vector<1x8x8xi1>, vector<1x8x8xf32>
    %cst_26 = arith.constant dense<0xFF800000> : vector<1x8xf32>
    %97 = vector.multi_reduction <maximumf>, %96, %cst_26 [2] : vector<1x8x8xf32> to vector<1x8xf32>
    %98 = vector.shape_cast %97 : vector<1x8xf32> to vector<1x8x1xf32>
    %99 = vector.broadcast %98 : vector<1x8x1xf32> to vector<1x8x8xf32>
    %100 = arith.subf %96, %99 : vector<1x8x8xf32>
    %101 = math.exp %100 : vector<1x8x8xf32>
    %cst_27 = arith.constant dense<0.000000e+00> : vector<1x8xf32>
    %102 = vector.multi_reduction <add>, %101, %cst_27 [2] : vector<1x8x8xf32> to vector<1x8xf32>
    %103 = vector.shape_cast %102 : vector<1x8xf32> to vector<1x8x1xf32>
    %104 = tpu.reciprocal %103 {approx = true} : vector<1x8x1xf32> -> vector<1x8x1xf32>
    %105 = vector.broadcast %104 : vector<1x8x1xf32> to vector<1x8x8xf32>
    %106 = arith.mulf %101, %105 : vector<1x8x8xf32>
    %107 = arith.truncf %106 : vector<1x8x8xf32> to vector<1x8x8xbf16>
    "tpu.trace_start"() <{level = 10 : i32, message = "bqk,bkd->bqd"}> : () -> ()
    %cst_28 = arith.constant dense<0.000000e+00> : vector<1x8x64xf32>
    %108 = tpu.matmul %107, %93, %cst_28 {dimension_numbers = #tpu.dot_dimension_numbers<[2], [1], [1], [2], [0, 0, 0, 1, 1, 2], [0], [0]>} : vector<1x8x8xbf16>, vector<1x8x64xbf16>, vector<1x8x64xf32> -> vector<1x8x64xf32>
    "tpu.trace_stop"() : () -> ()
    %109 = arith.truncf %108 : vector<1x8x64xf32> to vector<1x8x64xbf16>
    %110 = vector.extract_strided_slice %6 {offsets = [0, 0, 320], sizes = [1, 8, 64], strides = [1, 1, 1]} : vector<1x8x384xbf16> to vector<1x8x64xbf16>
    %111 = vector.extract_strided_slice %8 {offsets = [0, 0, 320], sizes = [1, 8, 64], strides = [1, 1, 1]} : vector<1x8x384xbf16> to vector<1x8x64xbf16>
    %112 = vector.extract_strided_slice %10 {offsets = [0, 0, 320], sizes = [1, 8, 64], strides = [1, 1, 1]} : vector<1x8x384xbf16> to vector<1x8x64xbf16>
    "tpu.trace_start"() <{level = 10 : i32, message = "bqd,bkd->bqk"}> : () -> ()
    %cst_29 = arith.constant dense<0.000000e+00> : vector<1x8x8xf32>
    %113 = tpu.matmul %110, %111, %cst_29 {dimension_numbers = #tpu.dot_dimension_numbers<[2], [2], [1], [1], [0, 0, 0, 1, 1, 1], [0], [0]>} : vector<1x8x64xbf16>, vector<1x8x64xbf16>, vector<1x8x8xf32> -> vector<1x8x8xf32>
    %cst_30 = arith.constant -1.000000e+30 : f32
    "tpu.trace_stop"() : () -> ()
    %114 = vector.broadcast %cst_30 : f32 to vector<1x8x8xf32>
    %115 = arith.select %14, %113, %114 : vector<1x8x8xi1>, vector<1x8x8xf32>
    %cst_31 = arith.constant dense<0xFF800000> : vector<1x8xf32>
    %116 = vector.multi_reduction <maximumf>, %115, %cst_31 [2] : vector<1x8x8xf32> to vector<1x8xf32>
    %117 = vector.shape_cast %116 : vector<1x8xf32> to vector<1x8x1xf32>
    %118 = vector.broadcast %117 : vector<1x8x1xf32> to vector<1x8x8xf32>
    %119 = arith.subf %115, %118 : vector<1x8x8xf32>
    %120 = math.exp %119 : vector<1x8x8xf32>
    %cst_32 = arith.constant dense<0.000000e+00> : vector<1x8xf32>
    %121 = vector.multi_reduction <add>, %120, %cst_32 [2] : vector<1x8x8xf32> to vector<1x8xf32>
    %122 = vector.shape_cast %121 : vector<1x8xf32> to vector<1x8x1xf32>
    %123 = tpu.reciprocal %122 {approx = true} : vector<1x8x1xf32> -> vector<1x8x1xf32>
    %124 = vector.broadcast %123 : vector<1x8x1xf32> to vector<1x8x8xf32>
    %125 = arith.mulf %120, %124 : vector<1x8x8xf32>
    %126 = arith.truncf %125 : vector<1x8x8xf32> to vector<1x8x8xbf16>
    "tpu.trace_start"() <{level = 10 : i32, message = "bqk,bkd->bqd"}> : () -> ()
    %cst_33 = arith.constant dense<0.000000e+00> : vector<1x8x64xf32>
    %127 = tpu.matmul %126, %112, %cst_33 {dimension_numbers = #tpu.dot_dimension_numbers<[2], [1], [1], [2], [0, 0, 0, 1, 1, 2], [0], [0]>} : vector<1x8x8xbf16>, vector<1x8x64xbf16>, vector<1x8x64xf32> -> vector<1x8x64xf32>
    "tpu.trace_stop"() : () -> ()
    %128 = arith.truncf %127 : vector<1x8x64xf32> to vector<1x8x64xbf16>
    %129 = tpu.concatenate %33, %52, %71, %90, %109, %128 in 2 : vector<1x8x64xbf16>, vector<1x8x64xbf16>, vector<1x8x64xbf16>, vector<1x8x64xbf16>, vector<1x8x64xbf16>, vector<1x8x64xbf16> -> vector<1x8x384xbf16>
    %130 = vector.shape_cast %129 : vector<1x8x384xbf16> to vector<8x384xbf16>
    %c0_34 = arith.constant 0 : index
    %c0_35 = arith.constant 0 : index
    %131 = vector.load %arg3[%c0_34, %c0_35] : memref<384x384xbf16, #tpu.memory_space<vmem>>, vector<384x384xbf16>
    %cst_36 = arith.constant dense<0.000000e+00> : vector<8x384xf32>
    %132 = tpu.matmul %130, %131, %cst_36 {dimension_numbers = #tpu.dot_dimension_numbers<[1], [0], [0], [1], [0, 0, 1, 1], [], []>} : vector<8x384xbf16>, vector<384x384xbf16>, vector<8x384xf32> -> vector<8x384xf32>
    %c0_37 = arith.constant 0 : index
    %c0_38 = arith.constant 0 : index
    %133 = vector.load %arg4[%c0_37, %c0_38] : memref<1x384xf32, #tpu.memory_space<vmem>>, vector<1x384xf32>
    %134 = vector.broadcast %133 : vector<1x384xf32> to vector<8x384xf32>
    %135 = arith.addf %132, %134 : vector<8x384xf32>
    %136 = vector.shape_cast %135 : vector<8x384xf32> to vector<1x8x384xf32>
    %c0_39 = arith.constant 0 : index
    %c0_40 = arith.constant 0 : index
    %c0_41 = arith.constant 0 : index
    %137 = vector.load %arg5[%c0_39, %c0_40, %c0_41] : memref<1x8x384xf32, #tpu.memory_space<vmem>>, vector<1x8x384xf32>
    tpu.vector_store %arg5[%c0_39, %c0_40, %c0_41], %136 {strides = array<i32>} : memref<1x8x384xf32, #tpu.memory_space<vmem>>, vector<1x8x384xf32>,
    return
  }
  func.func @transform_0(%arg0: i32) -> (i32, i32, i32) {
    %c0_i32 = arith.constant 0 : i32
    %c0_i32_0 = arith.constant 0 : i32
    %c0_i32_1 = arith.constant 0 : i32
    return %arg0, %c0_i32, %c0_i32_0 : i32, i32, i32
  }
  func.func @transform_1(%arg0: i32) -> (i32, i32) {
    %c0_i32 = arith.constant 0 : i32
    %c0_i32_0 = arith.constant 0 : i32
    %c0_i32_1 = arith.constant 0 : i32
    return %c0_i32, %c0_i32_0 : i32, i32
  }
  func.func @transform_2(%arg0: i32) -> (i32, i32) {
    %c0_i32 = arith.constant 0 : i32
    %c0_i32_0 = arith.constant 0 : i32
    %c0_i32_1 = arith.constant 0 : i32
    return %c0_i32, %c0_i32_0 : i32, i32
  }
  func.func @transform_3(%arg0: i32) -> (i32, i32) {
    %c0_i32 = arith.constant 0 : i32
    %c0_i32_0 = arith.constant 0 : i32
    %c0_i32_1 = arith.constant 0 : i32
    return %c0_i32, %c0_i32_0 : i32, i32
  }
  func.func @transform_4(%arg0: i32) -> (i32, i32, i32) {
    %c0_i32 = arith.constant 0 : i32
    %c0_i32_0 = arith.constant 0 : i32
    %c0_i32_1 = arith.constant 0 : i32
    return %arg0, %c0_i32, %c0_i32_0 : i32, i32, i32
  }
}

</mosaic_0001>

<bundles_post_ra>
// kernel: tpu_custom_call.1
= control target key start
LH: loop header
LB: loop body
LE: loop exit
PB: predicated region body
PF: predicated region fallthrough
CT: control target
= control target key end

     0   :  { %9 = vsyncpa [#allocation3], 0  ;;  %s5061_s0 = inlined_call_operand.hbm [shape: bf16[2,8,384], index: 0, kind: input, shape index: {}]   ;;  %s5062_s1 = inlined_call_operand.hbm [shape: bf16[384,1152], index: 1, kind: input, shape index: {}]   ;;  %s5063_s2 = inlined_call_operand.hbm [shape: bf16[384,384], index: 2, kind: input, shape index: {}]   ;;  %s5064_s3 = inlined_call_operand.vmem [shape: f32[1,384], index: 3, kind: input, shape index: {}]   ;;  %s5065_s4 = inlined_call_operand.hbm [shape: f32[2,8,384], index: 4, kind: output, shape index: {}]  }
   0x1   :  { %11 = vsyncpa [#allocation3 + $0x1], 0 }
   0x2   :  { %12 = vsyncpa [#allocation6], 0 }
   0x3   :  { %13 = vsyncpa [#allocation4], 0 }
   0x4   :  { %15 = vsyncpa [#allocation4 + $0x1], 0  ;;  %s4692_s15 = smov 0   ;;  %s4694_s16 = smov 0  }
   0x5   :  { %s4696_s17 = smov 0   ;;  %s4698_s18 = smov 0  }
   0x6 LB: > { %s4713_s19 = sadd.s32 4294967295, %s4653_s18   ;;  %s3476_s20 = sadd.s32 4294967294, %s4653_s18   ;;  %s4653_s18 = sphi %s4698_s18, %s5089_s18   ;;  %s4649_s17 = sphi %s4696_s17, %s5088_s17   ;;  %s4645_s16 = sphi %s4694_s16, %s5087_s16   ;;  %s4641_s15 = sphi %s4692_s15, %s5086_s15  }
   0x7   : > { %p41_p0 = scmp.ne.s32.totalorder %s4645_s16, %s4641_s15  ;;  %p5066_p1 = scmp.eq.s32.totalorder %s4713_s19, 0 }
   0x8   : > { %p134_p3 = scmp.eq.s32.totalorder %s3476_s20, 1  ;;  %p3477_p5 = scmp.ge.s32.totalorder %s4653_s18, 1 }
   0x9   : > { %p4722_p4 = por %p5066_p1, %p41_p0  ;;  %p141_p7 = scmp.lt.s32.totalorder %s4653_s18, 3 }
   0xa   : > { %p4727_p6 = por %p134_p3, %p41_p0  ;;  %s4655_s24 = smov [#allocation5]  }
   0xb   : > { %s5070_s21 = scalar_select %p4722_p4, 1, 0 }
   0xc   : > { %s5071_s22 = scalar_select %p4727_p6, 1, 0 }
   0xd   : > { %p4732_p8 = pnand %p3477_p5, %p141_p7  ;;  %s153_s25 = sshll.u32 %s4655_s24, 4  ;;  %s154_s25 = int_to_ptr.vmem [resolvable:$true] %s153_s25 }
   0xe   : > { %s4656_s27 = smov [#allocation7]   ;;  %s4516_s29 = scalar_lea.vmem %s154_s25, 27648 }
   0xf   : > { %s5072_s23 = scalar_select %p4732_p8, 1, 0 }
  0x10   : > { %p4006_p9 = pneg %p4732_p8  ;;  %s166_s28 = sshll.u32 %s4656_s27, 4  ;;  %s167_s28 = int_to_ptr.vmem [resolvable:$true] %s166_s28 }
  0x11   : > { %p4517_p13 = scmp.ne.s32.totalorder %s154_s25, %s4516_s29  ;;  %p4524_p5 = scmp.lt.s32.totalorder %s154_s25, %s154_s25 }
  0x12   : > { %p4741_p11 = pnand %p4006_p9, %p5066_p1  ;;  %p4525_p7 = scmp.lt.s32.totalorder %s4516_s29, %s4516_s29 }
  0x14   : > { %p4507_p12 = pneg %p4741_p11  ;;  %p4526_p10 = por %p4525_p7, %p4524_p5 }
  0x16   : > { %p4519_p0 = pnand %p4517_p13, %p4507_p12 }
  0x18   : > { %p4520_p3 = pneg %p4519_p0 }
  0x1a   : > { %p4527_p9 = pnand %p4526_p10, %p4520_p3 }
  0x1c   : > { %4530 = shalt.err (!%p4527_p9)
}
  0x1d   : > { %s4657_s30 = smov 576   ;;  %s4658_s5 = smov 36  }
  0x1e   : > { %4009 = dma.hbm_to_vmem [thread:$0]  (!%p4741_p11), %s5062_s1, 27648, %s154_s25, [#allocation6], %s4657_s30, %s4657_s30, %s4658_s5  }
  0x1f   : > { %s4542_s8 = scalar_lea.vmem %s167_s28, 9216  ;;  %p4550_p2 = scmp.lt.s32.totalorder %s167_s28, %s167_s28 }
  0x20   : > { %p4543_p1 = scmp.ne.s32.totalorder %s167_s28, %s4542_s8  ;;  %p4551_p6 = scmp.lt.s32.totalorder %s4542_s8, %s4542_s8 }
  0x22   : > { %p4545_p13 = pnand %p4543_p1, %p4507_p12  ;;  %p4552_p5 = por %p4551_p6, %p4550_p2 }
  0x24   : > { %p4546_p0 = pneg %p4545_p13 }
  0x26   : > { %p4553_p10 = pnand %p4552_p5, %p4546_p0 }
  0x28   : > { %4556 = shalt.err (!%p4553_p10)
}
  0x29   : > { %s4659_s9 = smov 192   ;;  %s4660_s10 = smov 12  }
  0x2a   : > { %4012 = dma.hbm_to_vmem [thread:$0]  (!%p4741_p11), %s5063_s2, 9216, %s167_s28, [#allocation6], %s4659_s9, %s4659_s9, %s4660_s10  }
  0x2b   : > { %s4764_s13 = sadd.s32 1, %s4653_s18   ;;  %s28_s20 = sadd.s32 1, %s4649_s17 }
  0x2c   : > { %s25_s14 = ssub.s32 %s4653_s18, %s4764_s13  ;;  %p35_p2 = scmp.ne.s32.totalorder %s4649_s17, %s4645_s16 }
  0x2d   : > { %p26_p1 = scmp.eq.s32.totalorder %s25_s14, 0  ;;  %p36_p6 = scmp.eq.s32.totalorder %s4653_s18, 0 }
  0x2e   : > { %p5074_p3 = scmp.eq.s32.totalorder %s4713_s19, 1  ;;  %p4023_p9 = scmp.lt.s32.totalorder %s4653_s18, 2 }
  0x2f   : > { %s4773_s24 = scalar_select %p26_p1, %s4649_s17, %s28_s20  }
  0x30   : > { %p37_p12 = por %p36_p6, %p35_p2  ;;  %p4777_p7 = por %p5074_p3, %p35_p2 }
  0x31   : > { %s183_s26 = sand.u32 1, %s4649_s17   ;;  %s3990_s28 = smul.u32 192, %s4653_s18 }
  0x32   : > { %s5075_s25 = scalar_select %p4777_p7, 1, 0 }
  0x33   : > { %s3989_s27 = smul.u32 12, %s183_s26  ;;  %p4784_p11 = pnand %p4023_p9, %p37_p12 }
  0x34   : > { %s4791_s6 = scalar_lea.hbm %s5061_s0, %s3990_s28  ;;  %s184_s9 = scalar_lea.sflag [#allocation3], %s183_s26 }
  0x35   : > { %s187_s7 = scalar_lea.vmem [#allocation2], %s3989_s27  ;;  %s4557_s10 = scalar_lea.hbm %s4791_s6, 192 }
  0x36   : > { %s195_s8 = sshll.u32 %s187_s7, 4  ;;  %p4558_p13 = scmp.ne.s32.totalorder %s4791_s6, %s4557_s10  ;;  %s196_s8 = int_to_ptr.vmem [resolvable:$true] %s195_s8 }
  0x37   : > { %p4559_p0 = pneg %p4784_p11  ;;  %s4562_s14 = scalar_lea.hbm %s5061_s0, 384 }
  0x38   : > { %p4563_p1 = scmp.lt.s32.totalorder %s4791_s6, %s5061_s0  ;;  %p4564_p2 = scmp.lt.s32.totalorder %s4562_s14, %s4557_s10 }
  0x39   : > { %p4560_p5 = pnand %p4559_p0, %p4558_p13 }
  0x3a   : > { %p4565_p6 = por %p4564_p2, %p4563_p1 }
  0x3b   : > { %p4561_p10 = pneg %p4560_p5 }
  0x3d   : > { %p4566_p12 = pnand %p4565_p6, %p4561_p10 }
  0x3f   : > { %4569 = shalt.err (!%p4566_p12)
}
  0x40   : > { %s4570_s27 = scalar_lea.vmem %s196_s8, 192  ;;  %s4661_s26 = smov [#allocation2]  }
  0x41   : > { %p4571_p3 = scmp.ne.s32.totalorder %s196_s8, %s4570_s27  ;;  %s4575_s30 = sshll.u32 %s4661_s26, 4  ;;  %s4576_s30 = int_to_ptr.vmem [resolvable:$false] %s4575_s30 }
  0x42   : > { %s4577_s5 = scalar_lea.vmem %s4576_s30, 384  ;;  %p4578_p13 = scmp.lt.s32.totalorder %s196_s8, %s4576_s30 }
  0x43   : > { %p4573_p9 = pnand %p4571_p3, %p4559_p0  ;;  %p4579_p5 = scmp.lt.s32.totalorder %s4577_s5, %s4570_s27 }
  0x45   : > { %p4574_p7 = pneg %p4573_p9  ;;  %p4580_p4 = por %p4579_p5, %p4578_p13 }
  0x47   : > { %p4581_p8 = pnand %p4580_p4, %p4574_p7 }
  0x49   : > { %4584 = shalt.err (!%p4581_p8)
}
  0x4a   : > { %4016 = dma.hbm_to_vmem [thread:$0]  (!%p4784_p11), %s4791_s6, 192, %s196_s8, %s184_s9  }
  0x4b   : > { %p5077_p10 = scmp.ne.s32.totalorder %s5072_s23, 0 }
  0x4c   : > { %s4810_s7 = sand.u32 (!%p5077_p10), 1, %s4645_s16   ;;  %p5078_p0 = scmp.ne.s32.totalorder (!%p5077_p10), %s5070_s21, 0 }
  0x4d   : > { %204 = sbr.rel (%p5077_p10) target bundleno = 2013 (0x7dd), region = 36  ;;  %s207_s11 = scalar_lea.sflag (!%p5077_p10), [#allocation3], %s4810_s7 }
  0x4e   : > { %s3991_s10 = smul.u32 (!%p5077_p10), 12, %s4810_s7 }
  0x50   : > { %s4814_s12 = scalar_lea.vmem (!%p5077_p10), [#allocation2], %s3991_s10 }
  0x52   : > { %4628 = dma.done.wait (%p5078_p0), %s207_s11, 192  }
  0x53   : > { %4630 = vsyncadd (%p5078_p0), %s207_s11, 4294967104  ;;  %p5079_p4 = scmp.eq.s32.totalorder %s4713_s19, 0 }
  0x55   : > { %4632 = dma.done.wait (%p5079_p4), [#allocation6], 36864   ;;  %p5080_p8 = pmov %p5079_p4 }
  0x56   : > { %v4662_v0 = vmov 0   ;;  %v4069_v1 = vld [vmem:[#allocation5 + $0x1fc] ss:$36 sps:$4 sm:$0xff]   ;;  %v4075_v5 = vld [vmem:[#allocation5 + $0x1b4] ss:$36 sps:$4 sm:$0xff]   ;;  %vm4664_vm0 = vmmov 0  }
  0x57   : > { %4634 = vsyncadd (%p5080_p8), [#allocation6], 4294930432  ;;  %1674 = vmatprep.mubr.bf16.mxu1 %v4662_v0  ;;  %v4071_v2 = vld [vmem:[#allocation5 + $0x67c] ss:$36 sps:$4 sm:$0xff]   ;;  %1601 = vmatprep.subr.bf16.mxu0 %v4069_v1  ;;  %v4077_v6 = vld [vmem:[#allocation5 + $0x634] ss:$36 sps:$4 sm:$0xff]  }
  0x58   : > { %v4073_v3 = vld [vmem:[#allocation5 + $0x1f8] ss:$36 sps:$4 sm:$0xff]   ;;  %1642 = vmatprep.subr.bf16.mxu1 %v4071_v2  ;;  %v4079_v7 = vld [vmem:[#allocation5 + $0x1b0] ss:$36 sps:$4 sm:$0xff]   ;;  %v4085_v11 = vld [vmem:[#allocation5 + $0x168] ss:$36 sps:$4 sm:$0xff]  }
  0x59   : > { %v4074_v4 = vld [vmem:[#allocation5 + $0x678] ss:$36 sps:$4 sm:$0xff]   ;;  %1602 = vmatpush1.bf16.msra.mxu0 %v4073_v3  ;;  %v4080_v8 = vld [vmem:[#allocation5 + $0x630] ss:$36 sps:$4 sm:$0xff]   ;;  %v4086_v12 = vld [vmem:[#allocation5 + $0x5e8] ss:$36 sps:$4 sm:$0xff]  }
  0x5a   : > { %1643 = vmatpush1.bf16.msra.mxu1 %v4074_v4  ;;  %1603 = vmatprep.subr.bf16.mxu0 %v4075_v5  ;;  %v4081_v9 = vld [vmem:[#allocation5 + $0x16c] ss:$36 sps:$4 sm:$0xff]   ;;  %v4087_v13 = vld [vmem:[#allocation5 + $0x124] ss:$36 sps:$4 sm:$0xff]   ;;  %v4093_v17 = vld [vmem:[#allocation5 + $0xdc] ss:$36 sps:$4 sm:$0xff]  }
  0x5b   : > { %1644 = vmatprep.subr.bf16.mxu1 %v4077_v6  ;;  %v4083_v10 = vld [vmem:[#allocation5 + $0x5ec] ss:$36 sps:$4 sm:$0xff]   ;;  %v4089_v14 = vld [vmem:[#allocation5 + $0x5a4] ss:$36 sps:$4 sm:$0xff]   ;;  %v4095_v18 = vld [vmem:[#allocation5 + $0x55c] ss:$36 sps:$4 sm:$0xff]  }
  0x5c   : > { %v4091_v15 = vld [vmem:[#allocation5 + $0x120] ss:$36 sps:$4 sm:$0xff]   ;;  %v4097_v19 = vld [vmem:[#allocation5 + $0xd8] ss:$36 sps:$4 sm:$0xff]   ;;  %v4103_v23 = vld [vmem:[#allocation5 + $0x90] ss:$36 sps:$4 sm:$0xff]  }
  0x5d   : > { %1604 = vmatpush1.bf16.msra.mxu0 %v4079_v7  ;;  %v4092_v16 = vld [vmem:[#allocation5 + $0x5a0] ss:$36 sps:$4 sm:$0xff]   ;;  %v4098_v20 = vld [vmem:[#allocation5 + $0x558] ss:$36 sps:$4 sm:$0xff]   ;;  %v4104_v24 = vld [vmem:[#allocation5 + $0x510] ss:$36 sps:$4 sm:$0xff]  }
  0x5e   : > { %1645 = vmatpush1.bf16.msra.mxu1 %v4080_v8  ;;  %1605 = vmatprep.subr.bf16.mxu0 %v4081_v9  ;;  %v4099_v21 = vld [vmem:[#allocation5 + $0x94] ss:$36 sps:$4 sm:$0xff]   ;;  %v4105_v25 = vld [vmem:[#allocation5 + $0x4c] ss:$36 sps:$4 sm:$0xff]   ;;  %v4111_v29 = vld [vmem:[#allocation5 + $0x4] ss:$36 sps:$4 sm:$0xff]  }
  0x5f   : > { %1646 = vmatprep.subr.bf16.mxu1 %v4083_v10  ;;  %v4101_v22 = vld [vmem:[#allocation5 + $0x514] ss:$36 sps:$4 sm:$0xff]   ;;  %v4107_v26 = vld [vmem:[#allocation5 + $0x4cc] ss:$36 sps:$4 sm:$0xff]   ;;  %v4113_v30 = vld [vmem:[#allocation5 + $0x484] ss:$36 sps:$4 sm:$0xff]  }
  0x60   : > { %v4109_v27 = vld [vmem:[#allocation5 + $0x48] ss:$36 sps:$4 sm:$0xff]   ;;  %v4115_v31 = vld [vmem:[#allocation5] ss:$36 sps:$4 sm:$0xff]   ;;  %v4826_v35 = vld [vmem:[%s4814_s12 + $0x8] ss:$0 sps:$4 sm:$0xff]  }
  0x61   : > { %1606 = vmatpush1.bf16.msra.mxu0 %v4085_v11  ;;  %v4110_v28 = vld [vmem:[#allocation5 + $0x4c8] ss:$36 sps:$4 sm:$0xff]   ;;  %v4116_v32 = vld [vmem:[#allocation5 + $0x480] ss:$36 sps:$4 sm:$0xff]   ;;  %v4123_v37 = vld [vmem:[#allocation5 + $0x438] ss:$36 sps:$4 sm:$0xff]  }
  0x62   : > { %1647 = vmatpush1.bf16.msra.mxu1 %v4086_v12  ;;  %1607 = vmatprep.subr.bf16.mxu0 %v4087_v13  ;;  %v4117_v33 = vld [vmem:[#allocation5 + $0x43c] ss:$36 sps:$4 sm:$0xff]   ;;  %v4122_v34 = vld [vmem:[#allocation5 + $0x204] ss:$36 sps:$4 sm:$0xff]   ;;  %v4124_v38 = vld [vmem:[#allocation5 + $0x3f4] ss:$36 sps:$4 sm:$0xff]  }
  0x63   : > { %1648 = vmatprep.subr.bf16.mxu1 %v4089_v14  ;;  %v4120_v36 = vld [vmem:[#allocation5 + $0x200] ss:$36 sps:$4 sm:$0xff]   ;;  %v4126_v40 = vld [vmem:[#allocation5 + $0x1b8] ss:$36 sps:$4 sm:$0xff]   ;;  %v4129_v41 = vld [vmem:[#allocation5 + $0x3f0] ss:$36 sps:$4 sm:$0xff]  }
  0x64   : > { %v4128_v39 = vld [vmem:[#allocation5 + $0x1bc] ss:$36 sps:$4 sm:$0xff]   ;;  %v4130_v42 = vld [vmem:[#allocation5 + $0x3ac] ss:$36 sps:$4 sm:$0xff]   ;;  %v4134_v43 = vld [vmem:[#allocation5 + $0x174] ss:$36 sps:$4 sm:$0xff]  }
  0x65   : > { %1608 = vmatpush1.bf16.msra.mxu0 %v4091_v15  ;;  %v4132_v44 = vld [vmem:[#allocation5 + $0x170] ss:$36 sps:$4 sm:$0xff]   ;;  %v4135_v45 = vld [vmem:[#allocation5 + $0x3a8] ss:$36 sps:$4 sm:$0xff]   ;;  %v4141_v50 = vld [vmem:[#allocation5 + $0x360] ss:$36 sps:$4 sm:$0xff]  }
  0x66   : > { %1649 = vmatpush1.bf16.msra.mxu1 %v4092_v16  ;;  %1609 = vmatprep.subr.bf16.mxu0 %v4093_v17  ;;  %v4136_v46 = vld [vmem:[#allocation5 + $0x364] ss:$36 sps:$4 sm:$0xff]   ;;  %v4140_v47 = vld [vmem:[#allocation5 + $0x12c] ss:$36 sps:$4 sm:$0xff]   ;;  %v4142_v51 = vld [vmem:[#allocation5 + $0x31c] ss:$36 sps:$4 sm:$0xff]  }
  0x67   : > { %1650 = vmatprep.subr.bf16.mxu1 %v4095_v18  ;;  %v4138_v48 = vld [vmem:[#allocation5 + $0x128] ss:$36 sps:$4 sm:$0xff]   ;;  %v4144_v54 = vld [vmem:[#allocation5 + $0xe0] ss:$36 sps:$4 sm:$0xff]   ;;  %v4147_v55 = vld [vmem:[#allocation5 + $0x318] ss:$36 sps:$4 sm:$0xff]  }
  0x68   : > { %v244_v49 = vld [vmem:[%s4814_s12] sm:$0xff]  ;;  %v4152_v57 = vld [vmem:[#allocation5 + $0x9c] ss:$36 sps:$4 sm:$0xff]   ;;  %vm2023_vm1 = vcmask 523264   ;;  %s4665_s21 = smov 64   ;;  %vm2087_vm2 = vcmask 1043456  }
  0x69   : > { %1610 = vmatpush1.bf16.msra.mxu0 %v4097_v19  ;;  %v4830_v52 = vcombine.high %v244_v49, %v244_v49  ;;  %v4146_v53 = vld [vmem:[#allocation5 + $0xe4] ss:$36 sps:$4 sm:$0xff]   ;;  %v4148_v56 = vld [vmem:[#allocation5 + $0x2d4] ss:$36 sps:$4 sm:$0xff]   ;;  %v4154_v60 = vld [vmem:[#allocation5 + $0x28c] ss:$36 sps:$4 sm:$0xff]   ;;  %v4834_v7 = vcombine.low %v244_v49, %v244_v49 }
  0x6a   : > { %1651 = vmatpush1.bf16.msra.mxu1 %v4098_v20  ;;  %1611 = vmatprep.subr.bf16.mxu0 %v4099_v21  ;;  %v4150_v58 = vld [vmem:[#allocation5 + $0x98] ss:$36 sps:$4 sm:$0xff]   ;;  %v4153_v59 = vld [vmem:[#allocation5 + $0x2d0] ss:$36 sps:$4 sm:$0xff]   ;;  %v4159_v63 = vld [vmem:[#allocation5 + $0x288] ss:$36 sps:$4 sm:$0xff]  }
  0x6b   : > { %1652 = vmatprep.subr.bf16.mxu1 %v4101_v22  ;;  %1633 = vmatprep.mubr.bf16.mxu0 %v4830_v52  ;;  %v4158_v61 = vld [vmem:[#allocation5 + $0x54] ss:$36 sps:$4 sm:$0xff]   ;;  %v4160_v1 = vld [vmem:[#allocation5 + $0x244] ss:$36 sps:$4 sm:$0xff]   ;;  %v4164_v2 = vld [vmem:[#allocation5 + $0xc] ss:$36 sps:$4 sm:$0xff]  }
  0x6c   : > { %v4156_v62 = vld [vmem:[#allocation5 + $0x50] ss:$36 sps:$4 sm:$0xff]   ;;  %v4162_v3 = vld [vmem:[#allocation5 + $0x8] ss:$36 sps:$4 sm:$0xff]   ;;  %v4165_v4 = vld [vmem:[#allocation5 + $0x240] ss:$36 sps:$4 sm:$0xff]  }
  0x6d   : > { %1612 = vmatpush1.bf16.msra.mxu0 %v4103_v23  ;;  %v4170_v5 = vld [vmem:[#allocation5 + $0x444] ss:$36 sps:$4 sm:$0xff]   ;;  %v4176_v10 = vld [vmem:[#allocation5 + $0x3fc] ss:$36 sps:$4 sm:$0xff]   ;;  %v4182_v14 = vld [vmem:[#allocation5 + $0x3b4] ss:$36 sps:$4 sm:$0xff]  }
  0x6e   : > { %1653 = vmatpush1.bf16.msra.mxu1 %v4104_v24  ;;  %1613 = vmatprep.subr.bf16.mxu0 %v4105_v25  ;;  %v4173_v6 = vld [vmem:[#allocation5 + $0x684] ss:$36 sps:$4 sm:$0xff]   ;;  %v4179_v11 = vld [vmem:[#allocation5 + $0x63c] ss:$36 sps:$4 sm:$0xff]   ;;  %v4185_v15 = vld [vmem:[#allocation5 + $0x5f4] ss:$36 sps:$4 sm:$0xff]  }
  0x6f   : > { %1654 = vmatprep.subr.bf16.mxu1 %v4107_v26  ;;  %v4168_v8 = vld [vmem:[#allocation5 + $0x440] ss:$36 sps:$4 sm:$0xff]   ;;  %v4174_v12 = vld [vmem:[#allocation5 + $0x3f8] ss:$36 sps:$4 sm:$0xff]   ;;  %v4180_v16 = vld [vmem:[#allocation5 + $0x3b0] ss:$36 sps:$4 sm:$0xff]  }
  0x70   : > { %v4171_v9 = vld [vmem:[#allocation5 + $0x680] ss:$36 sps:$4 sm:$0xff]   ;;  %v4177_v13 = vld [vmem:[#allocation5 + $0x638] ss:$36 sps:$4 sm:$0xff]   ;;  %v4183_v17 = vld [vmem:[#allocation5 + $0x5f0] ss:$36 sps:$4 sm:$0xff]  }
  0x71   : > { %1614 = vmatpush1.bf16.msra.mxu0 %v4109_v27  ;;  %v4188_v18 = vld [vmem:[#allocation5 + $0x36c] ss:$36 sps:$4 sm:$0xff]   ;;  %v4194_v22 = vld [vmem:[#allocation5 + $0x324] ss:$36 sps:$4 sm:$0xff]   ;;  %v4200_v26 = vld [vmem:[#allocation5 + $0x2dc] ss:$36 sps:$4 sm:$0xff]  }
  0x72   : > { %1655 = vmatpush1.bf16.msra.mxu1 %v4110_v28  ;;  %1615 = vmatprep.subr.bf16.mxu0 %v4111_v29  ;;  %v4191_v19 = vld [vmem:[#allocation5 + $0x5ac] ss:$36 sps:$4 sm:$0xff]   ;;  %v4197_v23 = vld [vmem:[#allocation5 + $0x564] ss:$36 sps:$4 sm:$0xff]   ;;  %v4203_v27 = vld [vmem:[#allocation5 + $0x51c] ss:$36 sps:$4 sm:$0xff]  }
  0x73   : > { %1656 = vmatprep.subr.bf16.mxu1 %v4113_v30  ;;  %v4186_v20 = vld [vmem:[#allocation5 + $0x368] ss:$36 sps:$4 sm:$0xff]   ;;  %v4192_v24 = vld [vmem:[#allocation5 + $0x320] ss:$36 sps:$4 sm:$0xff]   ;;  %v4198_v28 = vld [vmem:[#allocation5 + $0x2d8] ss:$36 sps:$4 sm:$0xff]  }
  0x74   : > { %v4189_v21 = vld [vmem:[#allocation5 + $0x5a8] ss:$36 sps:$4 sm:$0xff]   ;;  %v4195_v25 = vld [vmem:[#allocation5 + $0x560] ss:$36 sps:$4 sm:$0xff]   ;;  %v4201_v29 = vld [vmem:[#allocation5 + $0x518] ss:$36 sps:$4 sm:$0xff]  }
  0x75   : > { %1616 = vmatpush1.bf16.msra.mxu0 %v4115_v31  ;;  %v4206_v30 = vld [vmem:[#allocation5 + $0x294] ss:$36 sps:$4 sm:$0xff]   ;;  %vm2071_vm4 = vcmask 64512   ;;  %s3992_s6 = smul.u32 24, %s4810_s7  ;;  %s3373_s26 = scalar_lea.sflag [#allocation4], %s4810_s7 }
  0x76   : > { %1657 = vmatpush1.bf16.msra.mxu1 %v4116_v32  ;;  %1617 = vmatprep.subr.bf16.mxu0 %v4117_v33  ;;  %v4209_v31 = vld [vmem:[#allocation5 + $0x4d4] ss:$36 sps:$4 sm:$0xff]   ;;  %s3993_s9 = smul.u32 384, %s4713_s19  ;;  %p5083_p11 = scmp.ne.s32.totalorder %s5075_s25, 0 }
  0x77   : > { %1683 = vmatprep.subr.bf16.mxu1 %v4122_v34  ;;  %v4204_v32 = vld [vmem:[#allocation5 + $0x290] ss:$36 sps:$4 sm:$0xff]   ;;  %v4222_v49 = vld [vmem:[#allocation5 + $0x178] ss:$36 sps:$4 sm:$0xff]   ;;  %s242_s8 = scalar_lea.vmem [#allocation8], %s3992_s6  ;;  %s4666_s19 = smov [#allocation8]  }
  0x78   : > { %v4207_v33 = vld [vmem:[#allocation5 + $0x4d0] ss:$36 sps:$4 sm:$0xff]   ;;  %s3387_s14 = sshll.u32 %s242_s8, 4  ;;  %s5024_s27 = scalar_lea.hbm %s5065_s4, %s3993_s9  ;;  %s3388_s14 = int_to_ptr.vmem [resolvable:$true] %s3387_s14 }
  0x79   : > { %1675 = vmatmul.mubr.bf16.vlgmr.msra.gmra.mxu1 %v4826_v35  ;;  %1618 = vmatpush2.bf16.msra.mxu0 %v4123_v37  ;;  %v4212_v34 = vld [vmem:[#allocation5 + $0x24c] ss:$36 sps:$4 sm:$0xff]   ;;  %s4585_s30 = scalar_lea.vmem %s3388_s14, 384  ;;  %s4589_s5 = sshll.u32 %s4666_s19, 4  ;;  %s4590_s5 = int_to_ptr.vmem [resolvable:$false] %s4589_s5 }
  0x7a   : > { %1684 = vmatpush1.bf16.msra.mxu1 %v4120_v36  ;;  %1619 = vmatprep.subr.bf16.mxu0 %v4124_v38  ;;  %v4215_v36 = vld [vmem:[#allocation5 + $0x48c] ss:$36 sps:$4 sm:$0xff]   ;;  %p4586_p7 = scmp.ne.s32.totalorder %s3388_s14, %s4585_s30  ;;  %s4591_s10 = scalar_lea.vmem %s4590_s5, 768 }
  0x7b   : > { %1685 = vmatprep.subr.bf16.mxu1 %v4128_v39  ;;  %1715 = vmatprep.mubr.bf16.mxu1 %v4830_v52  ;;  %v4210_v37 = vld [vmem:[#allocation5 + $0x248] ss:$36 sps:$4 sm:$0xff]   ;;  %p4592_p6 = scmp.lt.s32.totalorder %s3388_s14, %s4590_s5  ;;  %p4593_p12 = scmp.lt.s32.totalorder %s4591_s10, %s4585_s30 }
  0x7c   : > { %v4213_v38 = vld [vmem:[#allocation5 + $0x488] ss:$36 sps:$4 sm:$0xff]   ;;  %p4587_p1 = pnand %p4586_p7, %p5083_p11 }
  0x7d   : > { %1620 = vmatpush2.bf16.msra.mxu0 %v4129_v41  ;;  %v4218_v39 = vld [vmem:[#allocation5 + $0x20c] ss:$36 sps:$4 sm:$0xff]   ;;  %p4594_p3 = por %p4593_p12, %p4592_p6 }
  0x7e   : > { %1686 = vmatpush1.bf16.msra.mxu1 %v4126_v40  ;;  %1621 = vmatprep.subr.bf16.mxu0 %v4130_v42  ;;  %v4245_v40 = vld [vmem:[#allocation5 + $0x68c] ss:$36 sps:$4 sm:$0xff]   ;;  %v4221_v42 = vld [vmem:[#allocation5 + $0x1c4] ss:$36 sps:$4 sm:$0xff]   ;;  %p4588_p2 = pneg %p4587_p1 }
  0x7f   : > { %1687 = vmatprep.subr.bf16.mxu1 %v4134_v43  ;;  %v4216_v41 = vld [vmem:[#allocation5 + $0x208] ss:$36 sps:$4 sm:$0xff]  }
  0x80   : > { %v4243_v43 = vld [vmem:[#allocation5 + $0x688] ss:$36 sps:$4 sm:$0xff]   ;;  %p4595_p9 = pnand %p4594_p3, %p4588_p2 }
  0x81   : > { %1622 = vmatpush2.bf16.msra.mxu0 %v4135_v45  ;;  %v4219_v45 = vld [vmem:[#allocation5 + $0x1c0] ss:$36 sps:$4 sm:$0xff]  }
  0x82   : > { %1688 = vmatpush1.bf16.msra.mxu1 %v4132_v44  ;;  %1623 = vmatprep.subr.bf16.mxu0 %v4136_v46  ;;  %v4251_v44 = vld [vmem:[#allocation5 + $0x644] ss:$36 sps:$4 sm:$0xff]   ;;  %v4224_v46 = vld [vmem:[#allocation5 + $0x17c] ss:$36 sps:$4 sm:$0xff]  }
  0x83   : > { %1689 = vmatprep.subr.bf16.mxu1 %v4140_v47  ;;  %v4249_v47 = vld [vmem:[#allocation5 + $0x640] ss:$36 sps:$4 sm:$0xff]  }
  0x85   : > { %1624 = vmatpush2.bf16.msra.mxu0 %v4141_v50  ;;  %v4227_v50 = vld [vmem:[#allocation5 + $0x134] ss:$36 sps:$4 sm:$0xff]  }
  0x86   : > { %1690 = vmatpush1.bf16.msra.mxu1 %v4138_v48  ;;  %1625 = vmatprep.subr.bf16.mxu0 %v4142_v51  ;;  %v4257_v48 = vld [vmem:[#allocation5 + $0x5fc] ss:$36 sps:$4 sm:$0xff]  }
  0x87   : > { %1691 = vmatprep.subr.bf16.mxu1 %v4146_v53  ;;  %v4255_v51 = vld [vmem:[#allocation5 + $0x5f8] ss:$36 sps:$4 sm:$0xff]  }
  0x88   : > { %v4263_v53 = vld [vmem:[#allocation5 + $0x5b4] ss:$36 sps:$4 sm:$0xff]  }
  0x89   : > { %1626 = vmatpush2.bf16.msra.mxu0 %v4147_v55  ;;  %v4230_v55 = vld [vmem:[#allocation5 + $0xec] ss:$36 sps:$4 sm:$0xff]  }
  0x8a   : > { %1692 = vmatpush1.bf16.msra.mxu1 %v4144_v54  ;;  %1627 = vmatprep.subr.bf16.mxu0 %v4148_v56  ;;  %v4225_v54 = vld [vmem:[#allocation5 + $0x130] ss:$36 sps:$4 sm:$0xff]  }
  0x8b   : > { %1693 = vmatprep.subr.bf16.mxu1 %v4152_v57  ;;  %v4261_v56 = vld [vmem:[#allocation5 + $0x5b0] ss:$36 sps:$4 sm:$0xff]  }
  0x8c   : > { %v4269_v57 = vld [vmem:[#allocation5 + $0x56c] ss:$36 sps:$4 sm:$0xff]  }
  0x8d   : > { %1628 = vmatpush2.bf16.msra.mxu0 %v4153_v59  ;;  %v4233_v59 = vld [vmem:[#allocation5 + $0xa4] ss:$36 sps:$4 sm:$0xff]  }
  0x8e   : > { %1694 = vmatpush1.bf16.msra.mxu1 %v4150_v58  ;;  %1629 = vmatprep.subr.bf16.mxu0 %v4154_v60  ;;  %v4228_v58 = vld [vmem:[#allocation5 + $0xe8] ss:$36 sps:$4 sm:$0xff]  }
  0x8f   : > { %1695 = vmatprep.subr.bf16.mxu1 %v4158_v61  ;;  %v4267_v60 = vld [vmem:[#allocation5 + $0x568] ss:$36 sps:$4 sm:$0xff]  }
  0x90   : > { %v4275_v61 = vld [vmem:[#allocation5 + $0x524] ss:$36 sps:$4 sm:$0xff]  }
  0x91   : > { %1630 = vmatpush2.bf16.msra.mxu0 %v4159_v63  ;;  %v4236_v63 = vld [vmem:[#allocation5 + $0x5c] ss:$36 sps:$4 sm:$0xff]  }
  0x92   : > { %1696 = vmatpush1.bf16.msra.mxu1 %v4156_v62  ;;  %1631 = vmatprep.subr.bf16.mxu0 %v4160_v1  ;;  %v4231_v62 = vld [vmem:[#allocation5 + $0xa0] ss:$36 sps:$4 sm:$0xff]  }
  0x93   : > { %1697 = vmatprep.subr.bf16.mxu1 %v4164_v2  ;;  %v4273_v1 = vld [vmem:[#allocation5 + $0x520] ss:$36 sps:$4 sm:$0xff]  }
  0x94   : > { %v4281_v2 = vld [vmem:[#allocation5 + $0x4dc] ss:$36 sps:$4 sm:$0xff]  }
  0x95   : > { %1632 = vmatpush2.bf16.msra.mxu0 %v4165_v4  ;;  %v4239_v4 = vld [vmem:[#allocation5 + $0x14] ss:$36 sps:$4 sm:$0xff]  }
  0x96   : > { %1698 = vmatpush1.bf16.msra.mxu1 %v4162_v3  ;;  %1724 = vmatprep.subr.bf16.mxu0 %v4173_v6  ;;  %v4234_v3 = vld [vmem:[#allocation5 + $0x58] ss:$36 sps:$4 sm:$0xff]  }
  0x97   : > { %1699 = vmatprep.subr.bf16.mxu1 %v4170_v5  ;;  %v4279_v5 = vld [vmem:[#allocation5 + $0x4d8] ss:$36 sps:$4 sm:$0xff]  }
  0x98   : > { %1634 = vmatmul.mubr.bf16.vlgmr.msra.gmra.mxu0 %v4834_v7  ;;  %v4287_v6 = vld [vmem:[#allocation5 + $0x494] ss:$36 sps:$4 sm:$0xff]  }
  0x99   : > { %1725 = vmatpush1.bf16.msra.mxu0 %v4171_v9  ;;  %1756 = vmatprep.mubr.bf16.mxu0 %v4662_v0  ;;  %v4242_v9 = vld [vmem:[#allocation5 + $0x44c] ss:$36 sps:$4 sm:$0xff]  }
  0x9a   : > { %1700 = vmatpush2.bf16.msra.mxu1 %v4168_v8  ;;  %1726 = vmatprep.subr.bf16.mxu0 %v4179_v11  ;;  %v4237_v8 = vld [vmem:[#allocation5 + $0x10] ss:$36 sps:$4 sm:$0xff]  }
  0x9b   : > { %1701 = vmatprep.subr.bf16.mxu1 %v4176_v10  ;;  %v4285_v10 = vld [vmem:[#allocation5 + $0x490] ss:$36 sps:$4 sm:$0xff]  }
  0x9c   : > { %v4290_v11 = vld [vmem:[#allocation5 + $0x214] ss:$36 sps:$4 sm:$0xff]  }
  0x9d   : > { %1727 = vmatpush1.bf16.msra.mxu0 %v4177_v13  ;;  %v4248_v13 = vld [vmem:[#allocation5 + $0x404] ss:$36 sps:$4 sm:$0xff]  }
  0x9e   : > { %1702 = vmatpush2.bf16.msra.mxu1 %v4174_v12  ;;  %1728 = vmatprep.subr.bf16.mxu0 %v4185_v15  ;;  %v4240_v12 = vld [vmem:[#allocation5 + $0x448] ss:$36 sps:$4 sm:$0xff]  }
  0x9f   : > { %1703 = vmatprep.subr.bf16.mxu1 %v4182_v14  ;;  %v4288_v14 = vld [vmem:[#allocation5 + $0x210] ss:$36 sps:$4 sm:$0xff]  }
  0xa0   : > { %v4293_v15 = vld [vmem:[#allocation5 + $0x1cc] ss:$36 sps:$4 sm:$0xff]  }
  0xa1   : > { %1729 = vmatpush1.bf16.msra.mxu0 %v4183_v17  ;;  %v4254_v17 = vld [vmem:[#allocation5 + $0x3bc] ss:$36 sps:$4 sm:$0xff]  }
  0xa2   : > { %1704 = vmatpush2.bf16.msra.mxu1 %v4180_v16  ;;  %1730 = vmatprep.subr.bf16.mxu0 %v4191_v19  ;;  %v4246_v16 = vld [vmem:[#allocation5 + $0x400] ss:$36 sps:$4 sm:$0xff]  }
  0xa3   : > { %1705 = vmatprep.subr.bf16.mxu1 %v4188_v18  ;;  %v4291_v18 = vld [vmem:[#allocation5 + $0x1c8] ss:$36 sps:$4 sm:$0xff]  }
  0xa4   : > { %v4296_v19 = vld [vmem:[#allocation5 + $0x184] ss:$36 sps:$4 sm:$0xff]  }
  0xa5   : > { %1731 = vmatpush1.bf16.msra.mxu0 %v4189_v21  ;;  %v4294_v21 = vld [vmem:[#allocation5 + $0x180] ss:$36 sps:$4 sm:$0xff]  }
  0xa6   : > { %1706 = vmatpush2.bf16.msra.mxu1 %v4186_v20  ;;  %1732 = vmatprep.subr.bf16.mxu0 %v4197_v23  ;;  %v4252_v20 = vld [vmem:[#allocation5 + $0x3b8] ss:$36 sps:$4 sm:$0xff]  }
  0xa7   : > { %1707 = vmatprep.subr.bf16.mxu1 %v4194_v22  ;;  %v4260_v22 = vld [vmem:[#allocation5 + $0x374] ss:$36 sps:$4 sm:$0xff]   ;;  %v4299_v23 = vld [vmem:[#allocation5 + $0x13c] ss:$36 sps:$4 sm:$0xff]  }
  0xa9   : > { %1733 = vmatpush1.bf16.msra.mxu0 %v4195_v25  ;;  %v4266_v25 = vld [vmem:[#allocation5 + $0x32c] ss:$36 sps:$4 sm:$0xff]  }
  0xaa   : > { %1708 = vmatpush2.bf16.msra.mxu1 %v4192_v24  ;;  %1734 = vmatprep.subr.bf16.mxu0 %v4203_v27  ;;  %v4258_v24 = vld [vmem:[#allocation5 + $0x370] ss:$36 sps:$4 sm:$0xff]   ;;  %v4264_v27 = vld [vmem:[#allocation5 + $0x328] ss:$36 sps:$4 sm:$0xff]  }
  0xab   : > { %1709 = vmatprep.subr.bf16.mxu1 %v4200_v26  ;;  %v4302_v26 = vld [vmem:[#allocation5 + $0xf4] ss:$36 sps:$4 sm:$0xff]  }
  0xad   : > { %1735 = vmatpush1.bf16.msra.mxu0 %v4201_v29  ;;  %v4300_v29 = vld [vmem:[#allocation5 + $0xf0] ss:$36 sps:$4 sm:$0xff]  }
  0xae   : > { %1710 = vmatpush2.bf16.msra.mxu1 %v4198_v28  ;;  %1736 = vmatprep.subr.bf16.mxu0 %v4209_v31  ;;  %v4272_v28 = vld [vmem:[#allocation5 + $0x2e4] ss:$36 sps:$4 sm:$0xff]  }
  0xaf   : > { %1711 = vmatprep.subr.bf16.mxu1 %v4206_v30  ;;  %v4305_v30 = vld [vmem:[#allocation5 + $0xac] ss:$36 sps:$4 sm:$0xff]   ;;  %v4270_v31 = vld [vmem:[#allocation5 + $0x2e0] ss:$36 sps:$4 sm:$0xff]  }
  0xb1   : > { %1737 = vmatpush1.bf16.msra.mxu0 %v4207_v33  ;;  %v4303_v33 = vld [vmem:[#allocation5 + $0xa8] ss:$36 sps:$4 sm:$0xff]  }
  0xb2   : > { %1712 = vmatpush2.bf16.msra.mxu1 %v4204_v32  ;;  %1738 = vmatprep.subr.bf16.mxu0 %v4215_v36  ;;  %v4278_v32 = vld [vmem:[#allocation5 + $0x29c] ss:$36 sps:$4 sm:$0xff]  }
  0xb3   : > { %1713 = vmatprep.subr.bf16.mxu1 %v4212_v34  ;;  %v4308_v34 = vld [vmem:[#allocation5 + $0x64] ss:$36 sps:$4 sm:$0xff]   ;;  %v4276_v36 = vld [vmem:[#allocation5 + $0x298] ss:$36 sps:$4 sm:$0xff]  }
  0xb5   : > { %1739 = vmatpush1.bf16.msra.mxu0 %v4213_v38  ;;  %v4284_v38 = vld [vmem:[#allocation5 + $0x254] ss:$36 sps:$4 sm:$0xff]  }
  0xb6   : > { %1714 = vmatpush2.bf16.msra.mxu1 %v4210_v37  ;;  %1765 = vmatprep.subr.bf16.mxu0 %v4218_v39  ;;  %v4306_v37 = vld [vmem:[#allocation5 + $0x60] ss:$36 sps:$4 sm:$0xff]  }
  0xb7   : > { %1806 = vmatprep.subr.bf16.mxu1 %v4245_v40  ;;  %v4311_v39 = vld [vmem:[#allocation5 + $0x1c] ss:$36 sps:$4 sm:$0xff]   ;;  %v4282_v40 = vld [vmem:[#allocation5 + $0x250] ss:$36 sps:$4 sm:$0xff]  }
  0xb8   : > { %1757 = vmatmul.mubr.bf16.vlgmr.msra.gmra.mxu0 %v4826_v35 }
  0xb9   : > { %1716 = vmatmul.mubr.bf16.vlgmr.msra.gmra.mxu1 %v4834_v7  ;;  %1766 = vmatpush1.bf16.msra.mxu0 %v4216_v41  ;;  %v4309_v41 = vld [vmem:[#allocation5 + $0x18] ss:$36 sps:$4 sm:$0xff]  }
  0xba   : > { %1807 = vmatpush1.bf16.msra.mxu1 %v4243_v43  ;;  %1767 = vmatprep.subr.bf16.mxu0 %v4221_v42  ;;  %v4314_v42 = vld [vmem:[#allocation5 + $0x454] ss:$36 sps:$4 sm:$0xff]  }
  0xbb   : > { %1808 = vmatprep.subr.bf16.mxu1 %v4251_v44  ;;  %1797 = vmatprep.mubr.bf16.mxu0 %v4830_v52  ;;  %v4317_v43 = vld [vmem:[#allocation5 + $0x694] ss:$36 sps:$4 sm:$0xff]  }
  0xbc   : > { %1838 = vmatprep.mubr.bf16.mxu1 %v4662_v0  ;;  %v4312_v44 = vld [vmem:[#allocation5 + $0x450] ss:$36 sps:$4 sm:$0xff]  }
  0xbd   : > { %1768 = vmatpush1.bf16.msra.mxu0 %v4219_v45  ;;  %v4315_v45 = vld [vmem:[#allocation5 + $0x690] ss:$36 sps:$4 sm:$0xff]  }
  0xbe   : > { %1809 = vmatpush1.bf16.msra.mxu1 %v4249_v47  ;;  %1769 = vmatprep.subr.bf16.mxu0 %v4224_v46  ;;  %v4320_v46 = vld [vmem:[#allocation5 + $0x40c] ss:$36 sps:$4 sm:$0xff]  }
  0xbf   : > { %1810 = vmatprep.subr.bf16.mxu1 %v4257_v48  ;;  %v4323_v47 = vld [vmem:[#allocation5 + $0x64c] ss:$36 sps:$4 sm:$0xff]  }
  0xc0   : > { %v4318_v48 = vld [vmem:[#allocation5 + $0x408] ss:$36 sps:$4 sm:$0xff]  }
  0xc1   : > { %1770 = vmatpush1.bf16.msra.mxu0 %v4222_v49  ;;  %v4321_v49 = vld [vmem:[#allocation5 + $0x648] ss:$36 sps:$4 sm:$0xff]  }
  0xc2   : > { %1811 = vmatpush1.bf16.msra.mxu1 %v4255_v51  ;;  %1771 = vmatprep.subr.bf16.mxu0 %v4227_v50  ;;  %v4326_v50 = vld [vmem:[#allocation5 + $0x3c4] ss:$36 sps:$4 sm:$0xff]  }
  0xc3   : > { %1812 = vmatprep.subr.bf16.mxu1 %v4263_v53  ;;  %v4329_v51 = vld [vmem:[#allocation5 + $0x604] ss:$36 sps:$4 sm:$0xff]  }
  0xc4   : > { %v4324_v53 = vld [vmem:[#allocation5 + $0x3c0] ss:$36 sps:$4 sm:$0xff]  }
  0xc5   : > { %1772 = vmatpush1.bf16.msra.mxu0 %v4225_v54  ;;  %v4327_v54 = vld [vmem:[#allocation5 + $0x600] ss:$36 sps:$4 sm:$0xff]  }
  0xc6   : > { %1813 = vmatpush1.bf16.msra.mxu1 %v4261_v56  ;;  %1773 = vmatprep.subr.bf16.mxu0 %v4230_v55  ;;  %v4332_v55 = vld [vmem:[#allocation5 + $0x37c] ss:$36 sps:$4 sm:$0xff]  }
  0xc7   : > { %1814 = vmatprep.subr.bf16.mxu1 %v4269_v57  ;;  %v4335_v56 = vld [vmem:[#allocation5 + $0x5bc] ss:$36 sps:$4 sm:$0xff]  }
  0xc8   : > { %v4330_v57 = vld [vmem:[#allocation5 + $0x378] ss:$36 sps:$4 sm:$0xff]  }
  0xc9   : > { %1774 = vmatpush1.bf16.msra.mxu0 %v4228_v58  ;;  %v4333_v58 = vld [vmem:[#allocation5 + $0x5b8] ss:$36 sps:$4 sm:$0xff]  }
  0xca   : > { %1815 = vmatpush1.bf16.msra.mxu1 %v4267_v60  ;;  %1775 = vmatprep.subr.bf16.mxu0 %v4233_v59  ;;  %v4338_v59 = vld [vmem:[#allocation5 + $0x334] ss:$36 sps:$4 sm:$0xff]  }
  0xcb   : > { %1816 = vmatprep.subr.bf16.mxu1 %v4275_v61  ;;  %v4341_v60 = vld [vmem:[#allocation5 + $0x574] ss:$36 sps:$4 sm:$0xff]  }
  0xcc   : > { %v4336_v61 = vld [vmem:[#allocation5 + $0x330] ss:$36 sps:$4 sm:$0xff]  }
  0xcd   : > { %1776 = vmatpush1.bf16.msra.mxu0 %v4231_v62  ;;  %v4339_v62 = vld [vmem:[#allocation5 + $0x570] ss:$36 sps:$4 sm:$0xff]  }
  0xce   : > { %1817 = vmatpush1.bf16.msra.mxu1 %v4273_v1  ;;  %1777 = vmatprep.subr.bf16.mxu0 %v4236_v63  ;;  %v4344_v63 = vld [vmem:[#allocation5 + $0x2ec] ss:$36 sps:$4 sm:$0xff]  }
  0xcf   : > { %1818 = vmatprep.subr.bf16.mxu1 %v4281_v2  ;;  %v4347_v1 = vld [vmem:[#allocation5 + $0x52c] ss:$36 sps:$4 sm:$0xff]  }
  0xd0   : > { %v4342_v2 = vld [vmem:[#allocation5 + $0x2e8] ss:$36 sps:$4 sm:$0xff]  }
  0xd1   : > { %1778 = vmatpush1.bf16.msra.mxu0 %v4234_v3  ;;  %v4345_v3 = vld [vmem:[#allocation5 + $0x528] ss:$36 sps:$4 sm:$0xff]  }
  0xd2   : > { %1819 = vmatpush1.bf16.msra.mxu1 %v4279_v5  ;;  %1779 = vmatprep.subr.bf16.mxu0 %v4239_v4  ;;  %v4350_v4 = vld [vmem:[#allocation5 + $0x2a4] ss:$36 sps:$4 sm:$0xff]  }
  0xd3   : > { %1820 = vmatprep.subr.bf16.mxu1 %v4287_v6  ;;  %v4353_v5 = vld [vmem:[#allocation5 + $0x4e4] ss:$36 sps:$4 sm:$0xff]  }
  0xd4   : > { %v4348_v6 = vld [vmem:[#allocation5 + $0x2a0] ss:$36 sps:$4 sm:$0xff]  }
  0xd5   : > { %1780 = vmatpush1.bf16.msra.mxu0 %v4237_v8  ;;  %v4351_v8 = vld [vmem:[#allocation5 + $0x4e0] ss:$36 sps:$4 sm:$0xff]  }
  0xd6   : > { %1821 = vmatpush1.bf16.msra.mxu1 %v4285_v10  ;;  %1781 = vmatprep.subr.bf16.mxu0 %v4242_v9  ;;  %v4356_v9 = vld [vmem:[#allocation5 + $0x25c] ss:$36 sps:$4 sm:$0xff]  }
  0xd7   : > { %1847 = vmatprep.subr.bf16.mxu1 %v4290_v11  ;;  %v4359_v10 = vld [vmem:[#allocation5 + $0x49c] ss:$36 sps:$4 sm:$0xff]  }
  0xd8   : > { %v4354_v11 = vld [vmem:[#allocation5 + $0x258] ss:$36 sps:$4 sm:$0xff]  }
  0xd9   : > { %1839 = vmatmul.mubr.bf16.vlgmr.msra.gmra.mxu1 %v4826_v35  ;;  %1782 = vmatpush2.bf16.msra.mxu0 %v4240_v12  ;;  %v4297_v35 = vld [vmem:[#allocation5 + $0x138] ss:$36 sps:$4 sm:$0xff]  }
  0xda   : > { %1848 = vmatpush1.bf16.msra.mxu1 %v4288_v14  ;;  %1783 = vmatprep.subr.bf16.mxu0 %v4248_v13  ;;  %v4357_v12 = vld [vmem:[#allocation5 + $0x498] ss:$36 sps:$4 sm:$0xff]  }
  0xdb   : > { %1849 = vmatprep.subr.bf16.mxu1 %v4293_v15  ;;  %1879 = vmatprep.mubr.bf16.mxu1 %v4830_v52  ;;  %v4361_v13 = vld [vmem:[#allocation5 + $0x458] ss:$36 sps:$4 sm:$0xff]  }
  0xdc   : > { %v4360_v14 = vld [vmem:[#allocation5 + $0x698] ss:$36 sps:$4 sm:$0xff]  }
  0xdd   : > { %1784 = vmatpush2.bf16.msra.mxu0 %v4246_v16  ;;  %v4362_v15 = vld [vmem:[#allocation5 + $0x218] ss:$36 sps:$4 sm:$0xff]   ;;  %v4663_v16 = vmov 0.0  }
  0xde   : > { %1850 = vmatpush1.bf16.msra.mxu1 %v4291_v18  ;;  %1785 = vmatprep.subr.bf16.mxu0 %v4254_v17  ;;  %v4364_v17 = vld [vmem:[#allocation5 + $0x410] ss:$36 sps:$4 sm:$0xff]  }
  0xdf   : > { %1851 = vmatprep.subr.bf16.mxu1 %v4296_v19  ;;  %v4504_v18 = vld [vmem:[%s4814_s12 + $0x8] ss:$0 sps:$4 sm:$0xff]  }
  0xe0   : > { %v4363_v19 = vld [vmem:[#allocation5 + $0x650] ss:$36 sps:$4 sm:$0xff]  }
  0xe1   : > { %1786 = vmatpush2.bf16.msra.mxu0 %v4252_v20  ;;  %v4365_v20 = vld [vmem:[#allocation5 + $0x1d0] ss:$36 sps:$4 sm:$0xff]  }
  0xe2   : > { %1852 = vmatpush1.bf16.msra.mxu1 %v4294_v21  ;;  %1787 = vmatprep.subr.bf16.mxu0 %v4260_v22  ;;  %v4367_v21 = vld [vmem:[#allocation5 + $0x3c8] ss:$36 sps:$4 sm:$0xff]  }
  0xe3   : > { %1853 = vmatprep.subr.bf16.mxu1 %v4299_v23  ;;  %v4366_v22 = vld [vmem:[#allocation5 + $0x608] ss:$36 sps:$4 sm:$0xff]  }
  0xe4   : > { %v4368_v23 = vld [vmem:[#allocation5 + $0x188] ss:$36 sps:$4 sm:$0xff]  }
  0xe5   : > { %1788 = vmatpush2.bf16.msra.mxu0 %v4258_v24  ;;  %v4370_v24 = vld [vmem:[#allocation5 + $0x380] ss:$36 sps:$4 sm:$0xff]  }
  0xe6   : > { %1854 = vmatpush1.bf16.msra.mxu1 %v4297_v35  ;;  %1789 = vmatprep.subr.bf16.mxu0 %v4266_v25  ;;  %v4369_v25 = vld [vmem:[#allocation5 + $0x5c0] ss:$36 sps:$4 sm:$0xff]  }
  0xe7   : > { %1855 = vmatprep.subr.bf16.mxu1 %v4302_v26  ;;  %v4371_v35 = vld [vmem:[#allocation5 + $0x140] ss:$36 sps:$4 sm:$0xff]   ;;  %v4373_v26 = vld [vmem:[#allocation5 + $0x338] ss:$36 sps:$4 sm:$0xff]  }
  0xe9   : > { %1790 = vmatpush2.bf16.msra.mxu0 %v4264_v27  ;;  %v4372_v27 = vld [vmem:[#allocation5 + $0x578] ss:$36 sps:$4 sm:$0xff]  }
  0xea   : > { %1856 = vmatpush1.bf16.msra.mxu1 %v4300_v29  ;;  %1791 = vmatprep.subr.bf16.mxu0 %v4272_v28  ;;  %v4376_v28 = vld [vmem:[#allocation5 + $0x2f0] ss:$36 sps:$4 sm:$0xff]  }
  0xeb   : > { %1857 = vmatprep.subr.bf16.mxu1 %v4305_v30  ;;  %v4375_v29 = vld [vmem:[#allocation5 + $0x530] ss:$36 sps:$4 sm:$0xff]  }
  0xec   : > { %v4377_v30 = vld [vmem:[#allocation5 + $0xb0] ss:$36 sps:$4 sm:$0xff]  }
  0xed   : > { %1792 = vmatpush2.bf16.msra.mxu0 %v4270_v31  ;;  %v4379_v31 = vld [vmem:[#allocation5 + $0x2a8] ss:$36 sps:$4 sm:$0xff]  }
  0xee   : > { %1858 = vmatpush1.bf16.msra.mxu1 %v4303_v33  ;;  %1793 = vmatprep.subr.bf16.mxu0 %v4278_v32  ;;  %v4378_v32 = vld [vmem:[#allocation5 + $0x4e8] ss:$36 sps:$4 sm:$0xff]  }
  0xef   : > { %1859 = vmatprep.subr.bf16.mxu1 %v4308_v34  ;;  %v4380_v33 = vld [vmem:[#allocation5 + $0x68] ss:$36 sps:$4 sm:$0xff]   ;;  %v4382_v34 = vld [vmem:[#allocation5 + $0x260] ss:$36 sps:$4 sm:$0xff]  }
  0xf1   : > { %1794 = vmatpush2.bf16.msra.mxu0 %v4276_v36  ;;  %v4381_v36 = vld [vmem:[#allocation5 + $0x4a0] ss:$36 sps:$4 sm:$0xff]  }
  0xf2   : > { %1860 = vmatpush1.bf16.msra.mxu1 %v4306_v37  ;;  %1795 = vmatprep.subr.bf16.mxu0 %v4284_v38  ;;  %v4383_v37 = vld [vmem:[#allocation5 + $0x20] ss:$36 sps:$4 sm:$0xff]  }
  0xf3   : > { %1861 = vmatprep.subr.bf16.mxu1 %v4311_v39 }
  0xf5   : > { %1796 = vmatpush2.bf16.msra.mxu0 %v4282_v40 }
  0xf6   : > { %1862 = vmatpush1.bf16.msra.mxu1 %v4309_v41  ;;  %1888 = vmatprep.subr.bf16.mxu0 %v4317_v43 }
  0xf7   : > { %1863 = vmatprep.subr.bf16.mxu1 %v4314_v42 }
  0xf8   : > { %1798 = vmatmul.mubr.bf16.vlgmr.msra.gmra.mxu0 %v4834_v7 }
  0xf9   : > { %1889 = vmatpush1.bf16.msra.mxu0 %v4315_v45  ;;  %1920 = vmatprep.mubr.bf16.mxu0 %v4662_v0 }
  0xfa   : > { %1864 = vmatpush2.bf16.msra.mxu1 %v4312_v44  ;;  %1890 = vmatprep.subr.bf16.mxu0 %v4323_v47 }
  0xfb   : > { %1865 = vmatprep.subr.bf16.mxu1 %v4320_v46 }
  0xfd   : > { %1891 = vmatpush1.bf16.msra.mxu0 %v4321_v49 }
  0xfe   : > { %1866 = vmatpush2.bf16.msra.mxu1 %v4318_v48  ;;  %1892 = vmatprep.subr.bf16.mxu0 %v4329_v51 }
  0xff   : > { %1867 = vmatprep.subr.bf16.mxu1 %v4326_v50 }
 0x101   : > { %1893 = vmatpush1.bf16.msra.mxu0 %v4327_v54 }
 0x102   : > { %1868 = vmatpush2.bf16.msra.mxu1 %v4324_v53  ;;  %1894 = vmatprep.subr.bf16.mxu0 %v4335_v56 }
 0x103   : > { %1869 = vmatprep.subr.bf16.mxu1 %v4332_v55 }
 0x105   : > { %1895 = vmatpush1.bf16.msra.mxu0 %v4333_v58 }
 0x106   : > { %1870 = vmatpush2.bf16.msra.mxu1 %v4330_v57  ;;  %1896 = vmatprep.subr.bf16.mxu0 %v4341_v60 }
 0x107   : > { %1871 = vmatprep.subr.bf16.mxu1 %v4338_v59 }
 0x109   : > { %1897 = vmatpush1.bf16.msra.mxu0 %v4339_v62 }
 0x10a   : > { %1872 = vmatpush2.bf16.msra.mxu1 %v4336_v61  ;;  %1898 = vmatprep.subr.bf16.mxu0 %v4347_v1 }
 0x10b   : > { %1873 = vmatprep.subr.bf16.mxu1 %v4344_v63 }
 0x10d   : > { %1899 = vmatpush1.bf16.msra.mxu0 %v4345_v3 }
 0x10e   : > { %1874 = vmatpush2.bf16.msra.mxu1 %v4342_v2  ;;  %1900 = vmatprep.subr.bf16.mxu0 %v4353_v5 }
 0x10f   : > { %1875 = vmatprep.subr.bf16.mxu1 %v4350_v4 }
 0x111   : > { %1901 = vmatpush1.bf16.msra.mxu0 %v4351_v8 }
 0x112   : > { %1876 = vmatpush2.bf16.msra.mxu1 %v4348_v6  ;;  %1902 = vmatprep.subr.bf16.mxu0 %v4359_v10 }
 0x113   : > { %1877 = vmatprep.subr.bf16.mxu1 %v4356_v9 }
 0x115   : > { %1903 = vmatpush1.bf16.msra.mxu0 %v4357_v12 }
 0x116   : > { %1878 = vmatpush2.bf16.msra.mxu1 %v4354_v11  ;;  %3791 = vmatprep.subr.bf16.mxu0 %v4361_v13 }
 0x117   : > { %3877 = vmatprep.subr.bf16.mxu1 %v4663_v16 }
 0x118   : > { %1921 = vmatmul.mubr.bf16.vlgmr.msra.gmra.mxu0 %v4504_v18 }
 0x119   : > { %1880 = vmatmul.mubr.bf16.vlgmr.msra.gmra.mxu1 %v4834_v7  ;;  %3792 = vmatpush3.bf16.msra.mxu0 %v4362_v15 }
 0x11a   : > { %3878 = vmatpush3.bf16.msra.mxu1 %v4360_v14  ;;  %3793 = vmatprep.subr.bf16.mxu0 %v4364_v17 }
 0x11b   : > { %3879 = vmatprep.subr.bf16.mxu1 %v4663_v16  ;;  %3893 = vmatprep.mubr.msk.bf16.mxu1 %vm4664_vm0, %v4663_v16 }
 0x11c   : > { %1961 = vmatprep.mubr.bf16.mxu0 %v4830_v52  ;;  %v4374_v52 = vld [vmem:[#allocation5 + $0xf8] ss:$36 sps:$4 sm:$0xff]  }
 0x11d   : > { %3794 = vmatpush3.bf16.msra.mxu0 %v4365_v20 }
 0x11e   : > { %3880 = vmatpush3.bf16.msra.mxu1 %v4363_v19  ;;  %3795 = vmatprep.subr.bf16.mxu0 %v4367_v21 }
 0x11f   : > { %3881 = vmatprep.subr.bf16.mxu1 %v4663_v16 }
 0x121   : > { %3796 = vmatpush3.bf16.msra.mxu0 %v4368_v23 }
 0x122   : > { %3882 = vmatpush3.bf16.msra.mxu1 %v4366_v22  ;;  %3797 = vmatprep.subr.bf16.mxu0 %v4370_v24 }
 0x123   : > { %3883 = vmatprep.subr.bf16.mxu1 %v4663_v16 }
 0x125   : > { %3798 = vmatpush3.bf16.msra.mxu0 %v4371_v35 }
 0x126   : > { %3884 = vmatpush3.bf16.msra.mxu1 %v4369_v25  ;;  %3799 = vmatprep.subr.bf16.mxu0 %v4373_v26 }
 0x127   : > { %3885 = vmatprep.subr.bf16.mxu1 %v4663_v16 }
 0x129   : > { %3800 = vmatpush3.bf16.msra.mxu0 %v4374_v52 }
 0x12a   : > { %3886 = vmatpush3.bf16.msra.mxu1 %v4372_v27  ;;  %3801 = vmatprep.subr.bf16.mxu0 %v4376_v28 }
 0x12b   : > { %3887 = vmatprep.subr.bf16.mxu1 %v4663_v16 }
 0x12d   : > { %3802 = vmatpush3.bf16.msra.mxu0 %v4377_v30 }
 0x12e   : > { %3888 = vmatpush3.bf16.msra.mxu1 %v4375_v29  ;;  %3803 = vmatprep.subr.bf16.mxu0 %v4379_v31 }
 0x12f   : > { %3889 = vmatprep.subr.bf16.mxu1 %v4663_v16 }
 0x131   : > { %3804 = vmatpush3.bf16.msra.mxu0 %v4380_v33 }
 0x132   : > { %3890 = vmatpush3.bf16.msra.mxu1 %v4378_v32  ;;  %3805 = vmatprep.subr.bf16.mxu0 %v4382_v34 }
 0x133   : > { %3891 = vmatprep.subr.bf16.mxu1 %v4663_v16 }
 0x135   : > { %3806 = vmatpush3.bf16.msra.mxu0 %v4383_v37 }
 0x136   : > { %3892 = vmatpush3.bf16.msra.mxu1 %v4381_v36  ;;  %3921 = vmatprep.subr.bf16.mxu0 %v4663_v16  ;;  %v2018_v36 = vlaneseq }
 0x137   : > { %3897 = vmatprep.subr.bf16.mxu1 %v4663_v16 }
 0x138   : > { %1962 = vmatmul.mubr.bf16.vlgmr.msra.gmra.mxu0 %v4834_v7  ;;  %v4896_v37 = vshrl.u32 %v2018_v36, 7 }
 0x139   : > { %v1676_v38 = vpop.f32.mrf.mxu1  ;;  %3894 = vmatmul.mubr.bf16.vlgmr.msra.gmra.mxu1 %v4504_v18  ;;  %3923 = vmatprep.mubr.msk.bf16.mxu0 %vm4664_vm0, %v4663_v16 }
 0x13a   : > { %3899 = vmatprep.mubr.msk.bf16.mxu1 %vm4664_vm0, %v4663_v16 }
 0x13b   : > { %v1678_v39 = vpop.f32.mrf.mxu1 }
 0x13d   : > { %v1680_v40 = vpop.f32.mrf.mxu1 }
 0x13f   : > { %v1681_v41 = vpop.f32.mrf.mxu1 }
 0x158   : > { %v1635_v42 = vpop.f32.mrf.mxu0 }
 0x159   : > { %v1677_v54 = vadd.f32 %v1676_v38, %v1635_v42  ;;  %v2021_v38 = vand.u32 127, %v2018_v36 }
 0x15a   : > { %v1637_v43 = vpop.f32.mrf.mxu0 }
 0x15b   : > { %v2009_v59 = vpack.c.bf16 %v1677_v54, %v1677_v54  ;;  %v1679_v60 = vadd.f32 %v1678_v39, %v1637_v43  ;;  %vm4899_vm3 = vcmp.ge.s32.totalorder %v4896_v37, %v2021_v38 }
 0x15c   : > { %v1639_v44 = vpop.f32.mrf.mxu0 }
 0x15d   : > { %v2010_v61 = vpack.c.bf16 %v1679_v60, %v1679_v60 }
 0x15e   : > { %v1640_v45 = vpop.f32.mrf.mxu0 }
 0x178   : > { %v1758_v47 = vpop.f32.mrf.mxu0 }
 0x179   : > { %v1717_v46 = vpop.f32.mrf.mxu1 }
 0x17a   : > { %v1759_v48 = vadd.f32 %v1758_v47, %v1717_v46  ;;  %v1760_v50 = vpop.f32.mrf.mxu0 }
 0x17b   : > { %v1719_v49 = vpop.f32.mrf.mxu1 }
 0x17c   : > { %v1761_v51 = vadd.f32 %v1760_v50, %v1719_v49  ;;  %v1762_v53 = vpop.f32.mrf.mxu0  ;;  %v4880_v13 = vpack.c.bf16 %v1759_v48, %v1759_v48 }
 0x17d   : > { %v1721_v7 = vpop.f32.mrf.mxu1 }
 0x17e   : > { %v2012_v55 = vpack.c.bf16 %v1761_v51, %v1761_v51  ;;  %v1763_v57 = vpop.f32.mrf.mxu0 }
 0x17f   : > { %v1722_v56 = vpop.f32.mrf.mxu1 }
 0x180   : > { %v2028_v58 = vsel %vm2023_vm1, %v2012_v55, 0  ;;  %2136 = vrot.lane.b32.xlu1 %v2012_v55, %s4665_s21 }
 0x181   : > { %3898 = vmatpush3.bf16.xpose.msra.mxu1 %v2028_v58 }
 0x182   : > { %3903 = vmatprep.subr.bf16.mxu1 %v4663_v16 }
 0x184   : > { %2133 = vrot.lane.b32.xlu1 %v2009_v59, %s4665_s21 }
 0x188   : > { %2354 = vrot.lane.b32.xlu1 %v2010_v61, %s4665_s21  ;;  %3900 = vmatmul.mubr.msk.bf16.vlgmr.msra.gmra.mxu1 %vm2023_vm1, %v2009_v59 }
 0x189   : > { %3905 = vmatprep.mubr.msk.bf16.mxu1 %vm4664_vm0, %v4663_v16 }
 0x199   : > { %v1840_v62 = vpop.f32.mrf.mxu1 }
 0x19b   : > { %v1842_v63 = vpop.f32.mrf.mxu1 }
 0x19d   : > { %v1844_v1 = vpop.f32.mrf.mxu1 }
 0x19f   : > { %v1845_v2 = vpop.f32.mrf.mxu1 }
 0x1b8   : > { %v1799_v3 = vpop.f32.mrf.mxu0 }
 0x1b9   : > { %v1841_v4 = vadd.f32 %v1840_v62, %v1799_v3 }
 0x1ba   : > { %v1801_v5 = vpop.f32.mrf.mxu0 }
 0x1bb   : > { %v2013_v6 = vpack.c.bf16 %v1841_v4, %v1841_v4  ;;  %v1843_v8 = vadd.f32 %v1842_v63, %v1801_v5 }
 0x1bc   : > { %v1803_v9 = vpop.f32.mrf.mxu0 }
 0x1bd   : > { %v2251_v10 = vsel %vm2023_vm1, %v2013_v6, 0  ;;  %v4875_v11 = vpack.c.bf16 %v1843_v8, %v1843_v8 }
 0x1be   : > { %3922 = vmatpush3.bf16.xpose.msra.mxu0 %v2251_v10  ;;  %v1804_v12 = vpop.f32.mrf.mxu0 }
 0x1bf   : > { %2578 = vrot.lane.b32.xlu1 %v4875_v11, %s4665_s21  ;;  %3933 = vmatprep.subr.bf16.mxu0 %v4663_v16  ;;  %v2472_v63 = vsel %vm2023_vm1, %v4875_v11, 0 }
 0x1c3   : > { %2575 = vrot.lane.b32.xlu1 %v4880_v13, %s4665_s21 }
 0x1c5   : > { %3924 = vmatmul.mubr.msk.bf16.vlgmr.msra.gmra.mxu0 %vm2023_vm1, %v2010_v61 }
 0x1c6   : > { %3935 = vmatprep.mubr.msk.bf16.mxu0 %vm4664_vm0, %v4663_v16 }
 0x1d8   : > { %v1922_v15 = vpop.f32.mrf.mxu0 }
 0x1d9   : > { %v1881_v14 = vpop.f32.mrf.mxu1 }
 0x1da   : > { %v1923_v17 = vadd.f32 %v1922_v15, %v1881_v14  ;;  %v1924_v19 = vpop.f32.mrf.mxu0 }
 0x1db   : > { %v1883_v18 = vpop.f32.mrf.mxu1 }
 0x1dc   : > { %v4887_v20 = vpack.c.bf16 %v1923_v17, %v1923_v17  ;;  %v4889_v21 = vadd.f32 %v1924_v19, %v1883_v18  ;;  %v1926_v23 = vpop.f32.mrf.mxu0 }
 0x1dd   : > { %v1885_v22 = vpop.f32.mrf.mxu1 }
 0x1de   : > { %v2089_v24 = vsel %vm2087_vm2, %v4887_v20, 0  ;;  %v1927_v35 = vpop.f32.mrf.mxu0 }
 0x1df   : > { %v1886_v25 = vpop.f32.mrf.mxu1  ;;  %3904 = vmatpush3.bf16.msra.mxu1 %v2089_v24 }
 0x1e0   : > { %3909 = vmatprep.subr.bf16.mxu1 %v4663_v16 }
 0x1f2   : > { %v2137_v57 = vpop.permute.xlu1 %2136 }
 0x1f3   : > { %v2142_v4 = vsel %vm2023_vm1, %v2137_v57, 0 }
 0x1f6   : > { %v2134_v61 = vpop.permute.xlu1 %2133 }
 0x1f8   : > { %v3807_v27 = vpop.f32.mrf.mxu0 }
 0x1f9   : > { %v2003_v26 = vpop.f32.mrf.mxu1 }
 0x1fa   : > { %v3808_v28 = vpop.f32.mrf.mxu0  ;;  %v2355_v62 = vpop.permute.xlu1 %2354 }
 0x1fb   : > { %v3895_v52 = vpop.f32.mrf.mxu1  ;;  %v3809_v29 = vadd.f32 %v3808_v28, %v3807_v27 }
 0x1fc   : > { %v3810_v31 = vpop.f32.mrf.mxu0 }
 0x1fd   : > { %v2006_v30 = vpop.f32.mrf.mxu1  ;;  %v4894_v32 = vadd.f32 %v3809_v29, %v2003_v26 }
 0x1fe   : > { %v3811_v34 = vpop.f32.mrf.mxu0 }
 0x1ff   : > { %v3896_v33 = vpop.f32.mrf.mxu1 }
 0x231   : > { %v2579_v5 = vpop.permute.xlu1 %2578 }
 0x235   : > { %v2576_v8 = vpop.permute.xlu1 %2575 }
 0x248   : > { %v2064_v40 = vpop.f32.mrf.mxu1 }
 0x249   : > { %v2070_v41 = vsel %vm4899_vm3, %v2064_v40, -1e+30 }
 0x24a   : > { %v3901_v42 = vpop.f32.mrf.mxu1  ;;  %v2072_v43 = vsel %vm2071_vm4, %v2070_v41, -inf }
 0x24b   : > { %2073 = vmax.xlane.f32.xlu0 %v2072_v43 }
 0x24c   : > { %v2067_v44 = vpop.f32.mrf.mxu1 }
 0x24e   : > { %v3902_v45 = vpop.f32.mrf.mxu1 }
 0x285   : > { %v2287_v46 = vpop.f32.mrf.mxu0 }
 0x286   : > { %v2293_v55 = vsel %vm4899_vm3, %v2287_v46, -1e+30 }
 0x287   : > { %v3925_v47 = vpop.f32.mrf.mxu0  ;;  %v2294_v56 = vsel %vm2071_vm4, %v2293_v55, -inf }
 0x289   : > { %v2290_v48 = vpop.f32.mrf.mxu0 }
 0x28b   : > { %v3926_v49 = vpop.f32.mrf.mxu0 }
 0x2d4   : > { %v2074_v50 = vpop.xlane.xlu0 %2073 }
 0x2d5   : > { %v2075_v51 = vsub.f32 %v2070_v41, %v2074_v50 }
 0x2d7   : > { %v2076_v7 = vmul.f32 1.442695, %v2075_v51 }
 0x2d9   : > { %4480 = vpow2.f32 %v2076_v7 }
 0x2e6   : > { %v4481_v53 = vpop.eup %4480 }
 0x2e7   : > { %v2078_v54 = vsel %vm2071_vm4, %v4481_v53, 0.0 }
 0x2e8   : > { %2079 = vadd.xlane.f32.xlu0 %v2078_v54 }
 0x2fe   : > { %2357 = vrot.lane.b32.xlu0 %v2013_v6, %s4665_s21  ;;  %v2584_v6 = vsel %vm2023_vm1, %v2579_v5, 0 }
 0x31d   : > { %2295 = vmax.xlane.f32.xlu0 %v2294_v56 }
 0x371   : > { %v2080_v58 = vpop.xlane.xlu0 %2079 }
 0x372   : > { %4482 = vrcp.f32 %v2080_v58 }
 0x375   : > { %v2358_v59 = vpop.permute.xlu0 %2357 }
 0x376   : > { %v2363_v60 = vsel %vm2023_vm1, %v2358_v59, 0 }
 0x377   : > { %3934 = vmatpush3.bf16.xpose.msra.mxu0 %v2363_v60 }
 0x378   : > { %3945 = vmatprep.subr.bf16.mxu0 %v4663_v16 }
 0x37e   : > { %3936 = vmatmul.mubr.msk.bf16.vlgmr.msra.gmra.mxu0 %vm2023_vm1, %v2355_v62 }
 0x37f   : > { %v4483_v1 = vpop.eup %4482  ;;  %3946 = vmatpush3.bf16.xpose.msra.mxu0 %v2472_v63  ;;  %3947 = vmatprep.mubr.msk.bf16.mxu0 %vm4664_vm0, %v4663_v16 }
 0x380   : > { %v2082_v2 = vmul.f32 %v4483_v1, %v4481_v53  ;;  %3957 = vmatprep.subr.bf16.mxu0 %v4663_v16 }
 0x382   : > { %v2083_v3 = vpack.c.bf16 %v2082_v2, %v2082_v2 }
 0x384   : > { %3906 = vmatmul.mubr.msk.bf16.vlgmr.msra.gmra.mxu1 %vm2071_vm4, %v2083_v3  ;;  %v2017_v3 = vpack.c.bf16 %v4894_v32, %v4894_v32 }
 0x385   : > { %3910 = vmatpush3.bf16.xpose.msra.mxu1 %v2142_v4  ;;  %3911 = vmatprep.mubr.msk.bf16.mxu1 %vm4664_vm0, %v4663_v16  ;;  %v2016_v4 = vpack.c.bf16 %v4889_v21, %v4889_v21 }
 0x386   : > { %3948 = vmatmul.mubr.msk.bf16.vlgmr.msra.gmra.mxu0 %vm2023_vm1, %v4880_v13  ;;  %3915 = vmatprep.subr.bf16.mxu1 %v4663_v16 }
 0x387   : > { %3958 = vmatpush3.bf16.xpose.msra.mxu0 %v2584_v6  ;;  %3959 = vmatprep.mubr.msk.bf16.mxu0 %vm4664_vm0, %v4663_v16 }
 0x38c   : > { %3912 = vmatmul.mubr.msk.bf16.vlgmr.msra.gmra.mxu1 %vm2023_vm1, %v2134_v61 }
 0x38d   : > { %3917 = vmatprep.mubr.msk.bf16.mxu1 %vm4664_vm0, %v4663_v16 }
 0x38e   : > { %3960 = vmatmul.mubr.msk.bf16.vlgmr.msra.gmra.mxu0 %vm2023_vm1, %v2576_v8 }
 0x3a6   : > { %v2296_v9 = vpop.xlane.xlu0 %2295 }
 0x3a7   : > { %v2297_v10 = vsub.f32 %v2293_v55, %v2296_v9 }
 0x3a9   : > { %v2298_v12 = vmul.f32 1.442695, %v2297_v10 }
 0x3ab   : > { %4484 = vpow2.f32 %v2298_v12 }
 0x3b8   : > { %v4943_v38 = vpop.eup %4484 }
 0x3b9   : > { %v2300_v45 = vsel %vm2071_vm4, %v4943_v38, 0.0 }
 0x43e   : > { %v2399_v11 = vpop.f32.mrf.mxu0 }
 0x43f   : > { %v2405_v30 = vsel %vm4899_vm3, %v2399_v11, -1e+30 }
 0x440   : > { %v3937_v14 = vpop.f32.mrf.mxu0  ;;  %v2406_v42 = vsel %vm2071_vm4, %v2405_v30, -inf }
 0x442   : > { %v2402_v13 = vpop.f32.mrf.mxu0 }
 0x443   : > { %v2310_v13 = vsel %vm2087_vm2, %v2016_v4, 0 }
 0x444   : > { %v4933_v15 = vpop.f32.mrf.mxu1  ;;  %v3938_v17 = vpop.f32.mrf.mxu0 }
 0x446   : > { %v3907_v18 = vpop.f32.mrf.mxu1  ;;  %v2508_v19 = vpop.f32.mrf.mxu0 }
 0x447   : > { %v2514_v43 = vsel %vm4899_vm3, %v2508_v19, -1e+30 }
 0x448   : > { %v2128_v22 = vpop.f32.mrf.mxu1  ;;  %v3949_v23 = vpop.f32.mrf.mxu0  ;;  %v2515_v46 = vsel %vm2071_vm4, %v2514_v43, -inf }
 0x44a   : > { %v3908_v24 = vpop.f32.mrf.mxu1  ;;  %v2511_v25 = vpop.f32.mrf.mxu0 }
 0x44c   : > { %v2178_v35 = vpop.f32.mrf.mxu1  ;;  %v3950_v26 = vpop.f32.mrf.mxu0 }
 0x44d   : > { %v2184_v27 = vsel %vm4899_vm3, %v2178_v35, -1e+30  ;;  %v2531_v26 = vsel %vm2087_vm2, %v2017_v3, 0 }
 0x44e   : > { %v3913_v52 = vpop.f32.mrf.mxu1  ;;  %v2620_v28 = vpop.f32.mrf.mxu0  ;;  %v2185_v29 = vsel %vm2071_vm4, %v2184_v27, -inf }
 0x44f   : > { %v2626_v31 = vsel %vm4899_vm3, %v2620_v28, -1e+30  ;;  %2186 = vmax.xlane.f32.xlu1 %v2185_v29 }
 0x450   : > { %v2181_v33 = vpop.f32.mrf.mxu1  ;;  %v3961_v34 = vpop.f32.mrf.mxu0  ;;  %v2627_v36 = vsel %vm2071_vm4, %v2626_v31, -inf }
 0x451   : > { %2628 = vmax.xlane.f32.xlu0 %v2627_v36  ;;  %v4384_v34 = vld [vmem:[#allocation7 + $0xa8] ss:$12 sps:$4 sm:$0xff]   ;;  %v4386_v36 = vld [vmem:[#allocation7 + $0xac] ss:$12 sps:$4 sm:$0xff]  }
 0x452   : > { %v3914_v40 = vpop.f32.mrf.mxu1  ;;  %v2623_v41 = vpop.f32.mrf.mxu0  ;;  %3207 = vmatprep.subr.bf16.mxu0 %v4386_v36 }
 0x453   : > { %2407 = vmax.xlane.f32.xlu1 %v2406_v42  ;;  %3208 = vmatpush1.bf16.msra.mxu0 %v4384_v34  ;;  %v4387_v40 = vld [vmem:[#allocation7 + $0x90] ss:$12 sps:$4 sm:$0xff]   ;;  %v4390_v42 = vld [vmem:[#allocation7 + $0x78] ss:$12 sps:$4 sm:$0xff]  }
 0x454   : > { %v3962_v44 = vpop.f32.mrf.mxu0  ;;  %v4392_v41 = vld [vmem:[#allocation7 + $0x7c] ss:$12 sps:$4 sm:$0xff]   ;;  %v4456_v34 = vld [vmem:[#allocation7 + $0xc4] ss:$12 sps:$4 sm:$0xff]  }
 0x455   : > { %2301 = vadd.xlane.f32.xlu0 %v2300_v45  ;;  %v4393_v44 = vld [vmem:[#allocation7 + $0x60] ss:$12 sps:$4 sm:$0xff]  }
 0x456   : > { %v4398_v45 = vld [vmem:[#allocation7 + $0x4c] ss:$12 sps:$4 sm:$0xff]  }
 0x457   : > { %2516 = vmax.xlane.f32.xlu1 %v2515_v46  ;;  %v4396_v46 = vld [vmem:[#allocation7 + $0x48] ss:$12 sps:$4 sm:$0xff]  }
 0x4d8   : > { %v2187_v47 = vpop.xlane.xlu1 %2186 }
 0x4d9   : > { %v2188_v48 = vsub.f32 %v2184_v27, %v2187_v47  ;;  %v4399_v47 = vld [vmem:[#allocation7 + $0x30] ss:$12 sps:$4 sm:$0xff]  }
 0x4da   : > { %v2629_v49 = vpop.xlane.xlu0 %2628 }
 0x4db   : > { %v2189_v7 = vmul.f32 1.442695, %v2188_v48  ;;  %v2630_v53 = vsub.f32 %v2626_v31, %v2629_v49  ;;  %v4404_v48 = vld [vmem:[#allocation7 + $0x1c] ss:$12 sps:$4 sm:$0xff]   ;;  %v4402_v49 = vld [vmem:[#allocation7 + $0x18] ss:$12 sps:$4 sm:$0xff]  }
 0x4dc   : > { %v2408_v50 = vpop.xlane.xlu1 %2407 }
 0x4dd   : > { %v2409_v51 = vsub.f32 %v2405_v30, %v2408_v50  ;;  %v2631_v56 = vmul.f32 1.442695, %v2630_v53  ;;  %v4407_v50 = vld [vmem:[#allocation7 + $0x22c] ss:$12 sps:$4 sm:$0xff]   ;;  %v4410_v53 = vld [vmem:[#allocation7 + $0x4] ss:$12 sps:$4 sm:$0xff]  }
 0x4de   : > { %v2302_v8 = vpop.xlane.xlu0 %2301 }
 0x4df   : > { %v2410_v54 = vmul.f32 1.442695, %v2409_v51  ;;  %v4405_v51 = vld [vmem:[#allocation7 + $0x228] ss:$12 sps:$4 sm:$0xff]  }
 0x4e0   : > { %v2517_v55 = vpop.xlane.xlu1 %2516 }
 0x4e1   : > { %4486 = vpow2.f32 %v2410_v54  ;;  %v2518_v39 = vsub.f32 %v2514_v43, %v2517_v55  ;;  %v4395_v43 = vld [vmem:[#allocation7 + $0x64] ss:$12 sps:$4 sm:$0xff]   ;;  %v4413_v54 = vld [vmem:[#allocation7 + $0x214] ss:$12 sps:$4 sm:$0xff]  }
 0x4e2   : > { %4488 = vpow2.f32 %v2189_v7  ;;  %v4408_v7 = vld [vmem:[#allocation7] ss:$12 sps:$4 sm:$0xff]   ;;  %v4411_v55 = vld [vmem:[#allocation7 + $0x210] ss:$12 sps:$4 sm:$0xff]  }
 0x4e3   : > { %v2519_v57 = vmul.f32 1.442695, %v2518_v39  ;;  %v4416_v39 = vld [vmem:[#allocation7 + $0x16c] ss:$12 sps:$4 sm:$0xff]  }
 0x4e5   : > { %4490 = vpow2.f32 %v2519_v57  ;;  %v4419_v57 = vld [vmem:[#allocation7 + $0x1fc] ss:$12 sps:$4 sm:$0xff]  }
 0x4e6   : > { %4492 = vpow2.f32 %v2631_v56  ;;  %v4414_v56 = vld [vmem:[#allocation7 + $0x168] ss:$12 sps:$4 sm:$0xff]  }
 0x4ee   : > { %v4487_v58 = vpop.eup %4486 }
 0x4ef   : > { %v2412_v59 = vsel %vm2071_vm4, %v4487_v58, 0.0  ;;  %v4489_v60 = vpop.eup %4488 }
 0x4f0   : > { %2413 = vadd.xlane.f32.xlu1 %v2412_v59  ;;  %v2191_v62 = vsel %vm2071_vm4, %v4489_v60, 0.0  ;;  %v4417_v59 = vld [vmem:[#allocation7 + $0x1f8] ss:$12 sps:$4 sm:$0xff]  }
 0x4f2   : > { %v4491_v61 = vpop.eup %4490 }
 0x4f3   : > { %v2521_v63 = vsel %vm2071_vm4, %v4491_v61, 0.0  ;;  %v4493_v1 = vpop.eup %4492 }
 0x4f4   : > { %2192 = vadd.xlane.f32.xlu1 %v2191_v62  ;;  %2522 = vadd.xlane.f32.xlu0 %v2521_v63  ;;  %v2633_v2 = vsel %vm2071_vm4, %v4493_v1, 0.0  ;;  %v4428_v62 = vld [vmem:[#allocation7 + $0x13c] ss:$12 sps:$4 sm:$0xff]  }
 0x4f8   : > { %2634 = vadd.xlane.f32.xlu0 %v2633_v2 }
 0x505   : > { %2198 = vrot.lane.b32.xlu1 %v4887_v20, %s4665_s21 }
 0x509   : > { %2640 = vrot.lane.b32.xlu1 %v2017_v3, %s4665_s21  ;;  %v4426_v3 = vld [vmem:[#allocation7 + $0x138] ss:$12 sps:$4 sm:$0xff]  }
 0x50e   : > { %2419 = vrot.lane.b32.xlu0 %v2016_v4, %s4665_s21  ;;  %v4431_v4 = vld [vmem:[#allocation7 + $0x1cc] ss:$12 sps:$4 sm:$0xff]  }
 0x579   : > { %v2414_v5 = vpop.xlane.xlu1 %2413 }
 0x57d   : > { %v2193_v6 = vpop.xlane.xlu1 %2192  ;;  %v2523_v20 = vpop.xlane.xlu0 %2522 }
 0x57e   : > { %4494 = vrcp.f32 %v2193_v6  ;;  %v4434_v6 = vld [vmem:[#allocation7 + $0x124] ss:$12 sps:$4 sm:$0xff]  }
 0x57f   : > { %4496 = vrcp.f32 %v2302_v8 }
 0x580   : > { %4498 = vrcp.f32 %v2414_v5 }
 0x581   : > { %v2199_v9 = vpop.permute.xlu1 %2198  ;;  %v2635_v21 = vpop.xlane.xlu0 %2634  ;;  %4500 = vrcp.f32 %v2523_v20  ;;  %v4437_v20 = vld [vmem:[#allocation7 + $0x1b4] ss:$12 sps:$4 sm:$0xff]  }
 0x582   : > { %v2204_v10 = vsel %vm2087_vm2, %v2199_v9, 0  ;;  %4502 = vrcp.f32 %v2635_v21  ;;  %v4429_v9 = vld [vmem:[#allocation7 + $0x1c8] ss:$12 sps:$4 sm:$0xff]  }
 0x583   : > { %3916 = vmatpush3.bf16.msra.mxu1 %v2204_v10  ;;  %v4432_v10 = vld [vmem:[#allocation7 + $0x120] ss:$12 sps:$4 sm:$0xff]   ;;  %v4438_v21 = vld [vmem:[#allocation7 + $0x108] ss:$12 sps:$4 sm:$0xff]  }
 0x584   : > { %3927 = vmatprep.subr.bf16.mxu1 %v4663_v16 }
 0x585   : > { %v2420_v18 = vpop.permute.xlu0 %2419  ;;  %v2641_v52 = vpop.permute.xlu1 %2640 }
 0x586   : > { %v2425_v23 = vsel %vm2087_vm2, %v2420_v18, 0  ;;  %v2646_v30 = vsel %vm2087_vm2, %v2641_v52, 0  ;;  %v4446_v18 = vld [vmem:[#allocation7 + $0xf4] ss:$12 sps:$4 sm:$0xff]   ;;  %v4450_v52 = vld [vmem:[#allocation7 + $0xd8] ss:$12 sps:$4 sm:$0xff]  }
 0x58b   : > { %v4495_v32 = vpop.eup %4494 }
 0x58c   : > { %v2195_v11 = vmul.f32 %v4495_v32, %v4489_v60  ;;  %v4497_v14 = vpop.eup %4496  ;;  %v4420_v60 = vld [vmem:[#allocation7 + $0x150] ss:$12 sps:$4 sm:$0xff]  }
 0x58d   : > { %v2304_v17 = vmul.f32 %v4497_v14, %v4943_v38  ;;  %v4499_v22 = vpop.eup %4498  ;;  %v4389_v38 = vld [vmem:[#allocation7 + $0x94] ss:$12 sps:$4 sm:$0xff]   ;;  %v4435_v14 = vld [vmem:[#allocation7 + $0x1b0] ss:$12 sps:$4 sm:$0xff]  }
 0x58e   : > { %v2196_v12 = vpack.c.bf16 %v2195_v11, %v2195_v11  ;;  %v2416_v24 = vmul.f32 %v4499_v22, %v4487_v58  ;;  %v4501_v35 = vpop.eup %4500  ;;  %3209 = vmatprep.subr.bf16.mxu0 %v4389_v38  ;;  %v4422_v58 = vld [vmem:[#allocation7 + $0x154] ss:$12 sps:$4 sm:$0xff]   ;;  %v4440_v11 = vld [vmem:[#allocation7 + $0x10c] ss:$12 sps:$4 sm:$0xff]  }
 0x58f   : > { %v2305_v19 = vpack.c.bf16 %v2304_v17, %v2304_v17  ;;  %v2525_v27 = vmul.f32 %v4501_v35, %v4491_v61  ;;  %v4503_v29 = vpop.eup %4502  ;;  %3210 = vmatpush1.bf16.msra.mxu0 %v4387_v40  ;;  %v4425_v61 = vld [vmem:[#allocation7 + $0x1e4] ss:$12 sps:$4 sm:$0xff]   ;;  %v4452_v35 = vld [vmem:[#allocation7 + $0xdc] ss:$12 sps:$4 sm:$0xff]  }
 0x590   : > { %3918 = vmatmul.mubr.msk.bf16.vlgmr.msra.gmra.mxu1 %vm2071_vm4, %v2196_v12  ;;  %v2417_v25 = vpack.c.bf16 %v2416_v24, %v2416_v24  ;;  %v2637_v31 = vmul.f32 %v4503_v29, %v4493_v1  ;;  %3211 = vmatprep.subr.bf16.mxu0 %v4392_v41  ;;  %v4423_v1 = vld [vmem:[#allocation7 + $0x1e0] ss:$12 sps:$4 sm:$0xff]   ;;  %v4441_v22 = vld [vmem:[#allocation7 + $0x198] ss:$12 sps:$4 sm:$0xff]  }
 0x591   : > { %3928 = vmatpush3.bf16.msra.mxu1 %v2310_v13  ;;  %3929 = vmatprep.mubr.msk.bf16.mxu1 %vm4664_vm0, %v4663_v16  ;;  %v2526_v28 = vpack.c.bf16 %v2525_v27, %v2525_v27  ;;  %v4443_v13 = vld [vmem:[#allocation7 + $0x19c] ss:$12 sps:$4 sm:$0xff]   ;;  %v4449_v24 = vld [vmem:[#allocation7 + $0x184] ss:$12 sps:$4 sm:$0xff]   ;;  %v4447_v27 = vld [vmem:[#allocation7 + $0x180] ss:$12 sps:$4 sm:$0xff]  }
 0x592   : > { %3939 = vmatprep.subr.bf16.mxu1 %v4663_v16  ;;  %v2638_v33 = vpack.c.bf16 %v2637_v31, %v2637_v31 }
 0x593   : > { %3212 = vmatpush1.bf16.msra.mxu0 %v4390_v42 }
 0x594   : > { %3213 = vmatprep.subr.bf16.mxu0 %v4395_v43 }
 0x597   : > { %3214 = vmatpush1.bf16.msra.mxu0 %v4393_v44 }
 0x598   : > { %3930 = vmatmul.mubr.msk.bf16.vlgmr.msra.gmra.mxu1 %vm2071_vm4, %v2305_v19  ;;  %3215 = vmatprep.subr.bf16.mxu0 %v4398_v45 }
 0x599   : > { %3940 = vmatpush3.bf16.msra.mxu1 %v2425_v23  ;;  %3941 = vmatprep.mubr.msk.bf16.mxu1 %vm4664_vm0, %v4663_v16  ;;  %v4444_v23 = vld [vmem:[#allocation7 + $0xf0] ss:$12 sps:$4 sm:$0xff]  }
 0x59a   : > { %3951 = vmatprep.subr.bf16.mxu1 %v4663_v16 }
 0x59b   : > { %3216 = vmatpush1.bf16.msra.mxu0 %v4396_v46 }
 0x5a0   : > { %3942 = vmatmul.mubr.msk.bf16.vlgmr.msra.gmra.mxu1 %vm2071_vm4, %v2417_v25 }
 0x5a1   : > { %3952 = vmatpush3.bf16.msra.mxu1 %v2531_v26  ;;  %3953 = vmatprep.mubr.msk.bf16.mxu1 %vm4664_vm0, %v4663_v16 }
 0x5a2   : > { %3963 = vmatprep.subr.bf16.mxu1 %v4663_v16 }
 0x5a8   : > { %3954 = vmatmul.mubr.msk.bf16.vlgmr.msra.gmra.mxu1 %vm2071_vm4, %v2526_v28 }
 0x5a9   : > { %3964 = vmatpush3.bf16.msra.mxu1 %v2646_v30  ;;  %3965 = vmatprep.mubr.msk.bf16.mxu1 %vm4664_vm0, %v4663_v16  ;;  %v4453_v30 = vld [vmem:[#allocation7 + $0x170] ss:$12 sps:$4 sm:$0xff]  }
 0x5aa   : > { %3248 = vmatprep.subr.bf16.mxu1 %v4407_v50  ;;  %v4458_v50 = vld [vmem:[#allocation7 + $0x158] ss:$12 sps:$4 sm:$0xff]  }
 0x5b0   : > { %3966 = vmatmul.mubr.msk.bf16.vlgmr.msra.gmra.mxu1 %vm2071_vm4, %v2638_v33  ;;  %v4454_v33 = vld [vmem:[#allocation7 + $0xc0] ss:$12 sps:$4 sm:$0xff]  }
 0x5b1   : > { %3280 = vmatprep.mubr.bf16.mxu1 %v4662_v0  ;;  %v4401_v0 = vld [vmem:[#allocation7 + $0x34] ss:$12 sps:$4 sm:$0xff]   ;;  %3249 = vmatpush1.bf16.msra.mxu1 %v4405_v51 }
 0x5b2   : > { %3217 = vmatprep.subr.bf16.mxu0 %v4401_v0  ;;  %3250 = vmatprep.subr.bf16.mxu1 %v4413_v54  ;;  %v4459_v54 = vld [vmem:[#allocation7 + $0x98] ss:$12 sps:$4 sm:$0xff]  }
 0x5b3   : > { %3218 = vmatpush1.bf16.msra.mxu0 %v4399_v47 }
 0x5b4   : > { %3219 = vmatprep.subr.bf16.mxu0 %v4404_v48  ;;  %v4457_v48 = vld [vmem:[#allocation7 + $0xb0] ss:$12 sps:$4 sm:$0xff]  }
 0x5b5   : > { %3251 = vmatpush1.bf16.msra.mxu1 %v4411_v55  ;;  %v2131_v55 = vpack.c.bf16 %v4933_v15, %v4933_v15  ;;  %v4465_v15 = vld [vmem:[#allocation7 + $0x68] ss:$12 sps:$4 sm:$0xff]  }
 0x5b6   : > { %3252 = vmatprep.subr.bf16.mxu1 %v4419_v57  ;;  %v4461_v57 = vld [vmem:[#allocation7 + $0x140] ss:$12 sps:$4 sm:$0xff]  }
 0x5b7   : > { %3220 = vmatpush1.bf16.msra.mxu0 %v4402_v49 }
 0x5b8   : > { %3221 = vmatprep.subr.bf16.mxu0 %v4410_v53 }
 0x5b9   : > { %3253 = vmatpush1.bf16.msra.mxu1 %v4417_v59 }
 0x5ba   : > { %3254 = vmatprep.subr.bf16.mxu1 %v4425_v61  ;;  %v4463_v61 = vld [vmem:[#allocation7 + $0x218] ss:$12 sps:$4 sm:$0xff]  }
 0x5bb   : > { %3222 = vmatpush1.bf16.msra.mxu0 %v4408_v7 }
 0x5bc   : > { %3223 = vmatprep.subr.bf16.mxu0 %v4416_v39 }
 0x5bd   : > { %3255 = vmatpush1.bf16.msra.mxu1 %v4423_v1  ;;  %v4467_v1 = vld [vmem:[#allocation7 + $0x110] ss:$12 sps:$4 sm:$0xff]  }
 0x5be   : > { %3256 = vmatprep.subr.bf16.mxu1 %v4431_v4  ;;  %v4470_v4 = vld [vmem:[#allocation7 + $0xf8] ss:$12 sps:$4 sm:$0xff]  }
 0x5bf   : > { %3224 = vmatpush2.bf16.msra.mxu0 %v4414_v56  ;;  %v4460_v56 = vld [vmem:[#allocation7 + $0x230] ss:$12 sps:$4 sm:$0xff]  }
 0x5c0   : > { %3225 = vmatprep.subr.bf16.mxu0 %v4422_v58 }
 0x5c1   : > { %3257 = vmatpush1.bf16.msra.mxu1 %v4429_v9  ;;  %v4474_v9 = vld [vmem:[#allocation7 + $0x20] ss:$12 sps:$4 sm:$0xff]  }
 0x5c2   : > { %3258 = vmatprep.subr.bf16.mxu1 %v4437_v20  ;;  %v4476_v20 = vld [vmem:[#allocation7 + $0xc8] ss:$12 sps:$4 sm:$0xff]  }
 0x5c3   : > { %3226 = vmatpush2.bf16.msra.mxu0 %v4420_v60  ;;  %v4462_v60 = vld [vmem:[#allocation7 + $0x80] ss:$12 sps:$4 sm:$0xff]  }
 0x5c4   : > { %3227 = vmatprep.subr.bf16.mxu0 %v4428_v62  ;;  %v4464_v62 = vld [vmem:[#allocation7 + $0x128] ss:$12 sps:$4 sm:$0xff]  }
 0x5c5   : > { %3259 = vmatpush1.bf16.msra.mxu1 %v4435_v14  ;;  %v2810_v14 = vsub.s32 0, %v4896_v37 }
 0x5c6   : > { %3260 = vmatprep.subr.bf16.mxu1 %v4443_v13 }
 0x5c7   : > { %3228 = vmatpush2.bf16.msra.mxu0 %v4426_v3  ;;  %v4469_v3 = vld [vmem:[#allocation7 + $0x1e8] ss:$12 sps:$4 sm:$0xff]  }
 0x5c8   : > { %3229 = vmatprep.subr.bf16.mxu0 %v4434_v6  ;;  %v4472_v6 = vld [vmem:[#allocation7 + $0x1d0] ss:$12 sps:$4 sm:$0xff]  }
 0x5c9   : > { %3261 = vmatpush1.bf16.msra.mxu1 %v4441_v22 }
 0x5ca   : > { %3262 = vmatprep.subr.bf16.mxu1 %v4449_v24 }
 0x5cb   : > { %3230 = vmatpush2.bf16.msra.mxu0 %v4432_v10  ;;  %v4475_v10 = vld [vmem:[#allocation7 + $0x1b8] ss:$12 sps:$4 sm:$0xff]  }
 0x5cc   : > { %3231 = vmatprep.subr.bf16.mxu0 %v4440_v11  ;;  %v4478_v11 = vld [vmem:[#allocation7 + $0x1a0] ss:$12 sps:$4 sm:$0xff]  }
 0x5cd   : > { %3263 = vmatpush1.bf16.msra.mxu1 %v4447_v27 }
 0x5ce   : > { %3846 = vmatprep.subr.bf16.mxu1 %v4453_v30  ;;  %v2818_v30 = vsub.s32 2, %v4896_v37 }
 0x5cf   : > { %3232 = vmatpush2.bf16.msra.mxu0 %v4438_v21  ;;  %v2806_v21 = vld [vmem:[%s5064_s3] sm:$0x7] }
 0x5d0   : > { %3233 = vmatprep.subr.bf16.mxu0 %v4446_v18 }
 0x5d3   : > { %3234 = vmatpush2.bf16.msra.mxu0 %v4444_v23 }
 0x5d4   : > { %3235 = vmatprep.subr.bf16.mxu0 %v4452_v35 }
 0x5d7   : > { %3236 = vmatpush2.bf16.msra.mxu0 %v4450_v52 }
 0x5d8   : > { %3237 = vmatprep.subr.bf16.mxu0 %v4456_v34 }
 0x5db   : > { %3238 = vmatpush2.bf16.msra.mxu0 %v4454_v33  ;;  %v2819_v33 = vrot.slane %v2806_v21, %v2818_v30 }
 0x5dc   : > { %3969 = vmatprep.subr.bf16.mxu0 %v4663_v16 }
 0x650   : > { %v2240_v63 = vpop.f32.mrf.mxu1 }
 0x651   : > { %v2246_v2 = vpack.c.bf16 %v2240_v63, %v2240_v63  ;;  %v4466_v63 = vld [vmem:[#allocation7 + $0x200] ss:$12 sps:$4 sm:$0xff]  }
 0x652   : > { %v3919_v5 = vpop.f32.mrf.mxu1 }
 0x653   : > { %2690 = vrot.lane.b32.xlu0 %v2246_v2, %s4665_s21  ;;  %v4468_v2 = vld [vmem:[#allocation7 + $0x50] ss:$12 sps:$4 sm:$0xff]   ;;  %v4471_v5 = vld [vmem:[#allocation7 + $0x38] ss:$12 sps:$4 sm:$0xff]  }
 0x654   : > { %v2243_v8 = vpop.f32.mrf.mxu1 }
 0x655   : > { %v4473_v8 = vld [vmem:[#allocation7 + $0xe0] ss:$12 sps:$4 sm:$0xff]  }
 0x656   : > { %v3920_v32 = vpop.f32.mrf.mxu1 }
 0x657   : > { %v4477_v32 = vld [vmem:[#allocation7 + $0x8] ss:$12 sps:$4 sm:$0xff]  }
 0x658   : > { %v4988_v12 = vpop.f32.mrf.mxu1 }
 0x659   : > { %v2352_v7 = vpack.c.bf16 %v4988_v12, %v4988_v12  ;;  %v4479_v12 = vld [vmem:[#allocation7 + $0x188] ss:$12 sps:$4 sm:$0xff]  }
 0x65a   : > { %v3931_v17 = vpop.f32.mrf.mxu1 }
 0x65b   : > { %v2814_v17 = vsub.s32 1, %v4896_v37 }
 0x65c   : > { %v2349_v19 = vpop.f32.mrf.mxu1 }
 0x65d   : > { %v2811_v19 = vrot.slane %v2806_v21, %v2810_v14  ;;  %v2815_v23 = vrot.slane %v2806_v21, %v2814_v17 }
 0x65e   : > { %v3932_v25 = vpop.f32.mrf.mxu1 }
 0x660   : > { %v2461_v26 = vpop.f32.mrf.mxu1 }
 0x661   : > { %v2467_v46 = vpack.c.bf16 %v2461_v26, %v2461_v26 }
 0x662   : > { %v3943_v28 = vpop.f32.mrf.mxu1 }
 0x664   : > { %v2464_v29 = vpop.f32.mrf.mxu1 }
 0x666   : > { %v3944_v31 = vpop.f32.mrf.mxu1 }
 0x668   : > { %v2567_v36 = vpop.f32.mrf.mxu1 }
 0x669   : > { %v2573_v47 = vpack.c.bf16 %v2567_v36, %v2567_v36 }
 0x66a   : > { %v3955_v38 = vpop.f32.mrf.mxu1 }
 0x66c   : > { %v2570_v40 = vpop.f32.mrf.mxu1 }
 0x66e   : > { %v3956_v41 = vpop.f32.mrf.mxu1 }
 0x670   : > { %v2682_v42 = vpop.f32.mrf.mxu1 }
 0x671   : > { %v2688_v43 = vpack.c.bf16 %v2682_v42, %v2682_v42 }
 0x672   : > { %v3967_v44 = vpop.f32.mrf.mxu1 }
 0x673   : > { %2696 = vrot.lane.b32.xlu1 %v2688_v43, %s4665_s21 }
 0x674   : > { %v2685_v45 = vpop.f32.mrf.mxu1 }
 0x676   : > { %v3968_v0 = vpop.f32.mrf.mxu1 }
 0x677   : > { %2693 = vrot.lane.b32.xlu1 %v2467_v46, %s4665_s21 }
 0x6c5   : > { %v2691_v53 = vpop.permute.xlu0 %2690 }
 0x6c6   : > { %v2700_v59 = vsel %vm2023_vm1, %v2131_v55, %v2691_v53 }
 0x6e5   : > { %v2697_v49 = vpop.permute.xlu1 %2696 }
 0x6e6   : > { %v4994_v51 = vsel %vm2023_vm1, %v2573_v47, %v2697_v49 }
 0x6e7   : > { %3281 = vmatmul.mubr.bf16.vlgmr.msra.gmra.mxu1 %v4994_v51 }
 0x6e8   : > { %3847 = vmatpush3.bf16.msra.mxu1 %v4457_v48 }
 0x6e9   : > { %v2694_v39 = vpop.permute.xlu1 %2693  ;;  %3848 = vmatprep.subr.bf16.mxu1 %v4458_v50 }
 0x6ea   : > { %v2704_v58 = vsel %vm2023_vm1, %v2352_v7, %v2694_v39 }
 0x6eb   : > { %3239 = vmatprep.mubr.bf16.mxu0 %v2704_v58  ;;  %3321 = vmatprep.mubr.bf16.mxu1 %v2704_v58 }
 0x6ec   : > { %3849 = vmatpush3.bf16.msra.mxu1 %v4459_v54  ;;  %3240 = vmatmul.mubr.bf16.vlgmr.msra.gmra.mxu0 %v2700_v59 }
 0x6ed   : > { %3970 = vmatpush3.bf16.msra.mxu0 %v4460_v56  ;;  %3850 = vmatprep.subr.bf16.mxu1 %v4461_v57 }
 0x6ee   : > { %3971 = vmatprep.subr.bf16.mxu0 %v4663_v16  ;;  %3985 = vmatprep.mubr.msk.bf16.mxu0 %vm4664_vm0, %v4663_v16 }
 0x6f0   : > { %3851 = vmatpush3.bf16.msra.mxu1 %v4462_v60 }
 0x6f1   : > { %3972 = vmatpush3.bf16.msra.mxu0 %v4463_v61  ;;  %3852 = vmatprep.subr.bf16.mxu1 %v4464_v62 }
 0x6f2   : > { %3973 = vmatprep.subr.bf16.mxu0 %v4663_v16 }
 0x6f4   : > { %3853 = vmatpush3.bf16.msra.mxu1 %v4465_v15 }
 0x6f5   : > { %3974 = vmatpush3.bf16.msra.mxu0 %v4466_v63  ;;  %3854 = vmatprep.subr.bf16.mxu1 %v4467_v1 }
 0x6f6   : > { %3975 = vmatprep.subr.bf16.mxu0 %v4663_v16 }
 0x6f8   : > { %3855 = vmatpush3.bf16.msra.mxu1 %v4468_v2 }
 0x6f9   : > { %3976 = vmatpush3.bf16.msra.mxu0 %v4469_v3  ;;  %3856 = vmatprep.subr.bf16.mxu1 %v4470_v4 }
 0x6fa   : > { %3977 = vmatprep.subr.bf16.mxu0 %v4663_v16 }
 0x6fc   : > { %3857 = vmatpush3.bf16.msra.mxu1 %v4471_v5 }
 0x6fd   : > { %3978 = vmatpush3.bf16.msra.mxu0 %v4472_v6  ;;  %3858 = vmatprep.subr.bf16.mxu1 %v4473_v8 }
 0x6fe   : > { %3979 = vmatprep.subr.bf16.mxu0 %v4663_v16 }
 0x700   : > { %3859 = vmatpush3.bf16.msra.mxu1 %v4474_v9 }
 0x701   : > { %3980 = vmatpush3.bf16.msra.mxu0 %v4475_v10  ;;  %3860 = vmatprep.subr.bf16.mxu1 %v4476_v20 }
 0x702   : > { %3981 = vmatprep.subr.bf16.mxu0 %v4663_v16 }
 0x704   : > { %3861 = vmatpush3.bf16.msra.mxu1 %v4477_v32 }
 0x705   : > { %3982 = vmatpush3.bf16.msra.mxu0 %v4478_v11 }
 0x706   : > { %3983 = vmatprep.subr.bf16.mxu0 %v4663_v16 }
 0x707   : > { %3322 = vmatmul.mubr.bf16.vlgmr.msra.gmra.mxu1 %v2700_v59 }
 0x709   : > { %3984 = vmatpush3.bf16.msra.mxu0 %v4479_v12 }
 0x70c   : > { %3986 = vmatmul.mubr.bf16.vlgmr.msra.gmra.mxu0 %v4994_v51 }
 0x7a7   : > { %v3282_v13 = vpop.f32.mrf.mxu1 }
 0x7a9   : > { %v3284_v18 = vpop.f32.mrf.mxu1 }
 0x7ab   : > { %v3286_v22 = vpop.f32.mrf.mxu1 }
 0x7ac   : > { %v3241_v24 = vpop.f32.mrf.mxu0 }
 0x7ad   : > { %v3242_v16 = vadd.f32 %v3241_v24, %v2811_v19  ;;  %v3287_v25 = vpop.f32.mrf.mxu1 }
 0x7ae   : > { %v3243_v35 = vpop.f32.mrf.mxu0 }
 0x7af   : > { %v3283_v26 = vadd.f32 %v3282_v13, %v3242_v16  ;;  %v3244_v27 = vadd.f32 %v3243_v35, %v2815_v23 }
 0x7b0   : > { %v3245_v52 = vpop.f32.mrf.mxu0 }
 0x7b1   : > { %3369 = vst [vmem:[%s242_s8] sm:$0xff] %v3283_v26  ;;  %v3285_v28 = vadd.f32 %v3284_v18, %v3244_v27 }
 0x7b2   : > { %v3246_v29 = vpop.f32.mrf.mxu0 }
 0x7b3   : > { %3370 = vst [vmem:[%s242_s8 + $0x8] sm:$0xff] %v3285_v28 }
 0x7c7   : > { %v3862_v31 = vpop.f32.mrf.mxu1 }
 0x7c9   : > { %v3863_v34 = vpop.f32.mrf.mxu1 }
 0x7ca   : > { %v3864_v36 = vadd.f32 %v3863_v34, %v3862_v31 }
 0x7cb   : > { %v3865_v38 = vpop.f32.mrf.mxu1 }
 0x7cc   : > { %v3324_v40 = vadd.f32 %v3864_v36, %v2819_v33  ;;  %v3363_v41 = vpop.f32.mrf.mxu0 }
 0x7cd   : > { %v3866_v42 = vpop.f32.mrf.mxu1 }
 0x7ce   : > { %v3364_v43 = vadd.f32 %v3363_v41, %v3324_v40  ;;  %v3987_v44 = vpop.f32.mrf.mxu0 }
 0x7d0   : > { %3371 = vst [vmem:[%s242_s8 + $0x10] sm:$0xff] %v3364_v43  ;;  %v3366_v37 = vpop.f32.mrf.mxu0 }
 0x7d1   : > { %4598 = shalt.err (!%p4595_p9)
}
 0x7d2   : > { %s4599_s11 = scalar_lea.hbm %s5024_s27, 384  ;;  %s4603_s21 = scalar_lea.hbm %s5065_s4, 768 }
 0x7d3   : > { %p4600_p13 = scmp.ne.s32.totalorder %s5024_s27, %s4599_s11  ;;  %p4604_p0 = scmp.lt.s32.totalorder %s5024_s27, %s5065_s4 }
 0x7d4   : > { %p4605_p4 = scmp.lt.s32.totalorder %s4603_s21, %s4599_s11 }
 0x7d5   : > { %p4601_p5 = pnand %p4600_p13, %p5083_p11 }
 0x7d6   : > { %p4606_p8 = por %p4605_p4, %p4604_p0 }
 0x7d7   : > { %p4602_p10 = pneg %p4601_p5 }
 0x7d9   : > { %p4607_p7 = pnand %p4606_p8, %p4602_p10 }
 0x7db   : > { %4610 = shalt.err (!%p4607_p7)
}
 0x7dc   : > { %4004 = dma.vmem_to_hbm [thread:$0]  (%p5083_p11), %s3388_s14, 384, %s5024_s27, %s3373_s26   ;;  %v3988_v45 = vpop.f32.mrf.mxu0 }
 0x7dd PF: > { %s3399_s6 = sand.u32 1, %s4641_s15   ;;  %p5084_p1 = scmp.ne.s32.totalorder %s5071_s22, 0 }
 0x7de   : > { %p5085_p2 = scmp.ge.s32.totalorder %s4653_s18, 2  ;;  %s3400_s8 = scalar_lea.sflag [#allocation4], %s3399_s6 }
 0x7e0   : > { %p4018_p6 = pnand %p5085_p2, %p5084_p1 }
 0x7e2   : > { %p4019_p12 = pneg %p4018_p6 }
 0x7e4   : > { %4636 = dma.done.wait (%p4019_p12), %s3400_s8, 384  }
 0x7e5   : > { %4638 = vsyncadd (%p4019_p12), %s3400_s8, 4294966912  ;;  %p18_p3 = scmp.ge.s32.totalorder %s4764_s13, 4   ;;  %s5086_s15 = smov %s4645_s16 }
 0x7e6   : > { %s5087_s16 = smov %s4649_s17  ;;  %s5088_s17 = smov %s4773_s24 }
 0x7e7   : > { %s5089_s18 = smov %s4764_s13  ;;  %20 = sbr.rel (!%p18_p3) target bundleno = 6 (0x6), region = 89 }
 0x7ec   :  { %3405 = vsyncpa [#allocation3], 1 }
 0x7ed   :  { %3407 = vsyncpa [#allocation3 + $0x1], 1 }
 0x7ee   :  { %3408 = vsyncpa [#allocation6], 1 }
 0x7ef   :  { %3409 = vsyncpa [#allocation4], 1 }
 0x7f0   :  { %3411 = vsyncpa [#allocation4 + $0x1], 1 }

</bundles_post_ra>
